<compile_context>
chip_gen: v5e
topology: v5e:2x2
jax: 0.10.0
libtpu: 0.0.40
codegen_flags: <defaults>
</compile_context>

<pallas_src>
import functools

import jax
import jax.numpy as jnp
from jax.experimental import pallas as pl
from jax.experimental.pallas import tpu as pltpu


# ---------------------------------------------------------------------------
# Kernels
# ---------------------------------------------------------------------------

def occnet_kernel_simple(x_ref, w0a_ref, wh_ref, bh_ref, wo_ref, bo_ref, out_ref):
    """Feature-major MLP, one small matmul per layer (v5e / fallback path).

    x_ref:   (4, TM)    bf16   ([x; 1] rows -> layer-0 bias folded into w0a)
    w0a_ref: (H, 4)     bf16   ([w0^T | b0])
    wh_ref:  (L, H, H)  bf16   (per-layer W^T)
    bh_ref:  (L, H, 1)  f32
    wo_ref:  (1, H)     bf16
    bo_ref:  (1, 1)     f32
    out_ref: (1, TM)    f32    (lane-dense output block)
    """
    bf16 = jnp.bfloat16

    # Layer 0: bias already folded in; fused ReLU + bf16 cast (single activation copy).
    h = jnp.dot(w0a_ref[...], x_ref[...], preferred_element_type=jnp.float32)
    h = jnp.maximum(h, 0.0).astype(bf16)

    # Hidden layers: f32 accumulate, f32 bias add + ReLU (v5e has no bf16 VALU),
    # bf16 cast fused into the same expression -> one materialized copy per layer.
    n_hidden = wh_ref.shape[0]
    for i in range(n_hidden):
        acc = jnp.dot(wh_ref[i], h, preferred_element_type=jnp.float32)
        h = jnp.maximum(acc + bh_ref[i], 0.0).astype(bf16)

    # Output layer: (1, H) @ (H, TM) -> (1, TM), lane-dense.
    out = jnp.dot(wo_ref[...], h, preferred_element_type=jnp.float32) + bo_ref[...]
    out_ref[...] = out.astype(out_ref.dtype)


def occnet_kernel_blockdiag(x_ref, w0a_ref, wblk_ref, bstk_ref, wo_ref, bo_ref,
                            out_ref, *, n_sub):
    """Block-diagonal hidden-layer pipeline (v6e / v7x path).

    The L hidden-layer (H,H) weights are packed as a block-diagonal (L*H, L*H)
    matrix; the point tile is split into `n_sub` sub-tiles and layers are
    software-pipelined across sub-tiles so each MXU push applies L layers to L
    different sub-tiles (fills the 256x256 MXU instead of a 64x64 corner).

    x_ref:    (4, TM)        bf16
    w0a_ref:  (H, 4)         bf16
    wblk_ref: (L*H, L*H)     bf16   (block-diag of per-layer W^T)
    bstk_ref: (L*H, 1)       f32    (stacked hidden biases)
    wo_ref:   (1, H)         bf16
    bo_ref:   (1, 1)         f32
    out_ref:  (1, TM)        f32
    """
    bf16 = jnp.bfloat16
    H = w0a_ref.shape[0]
    LH = wblk_ref.shape[0]
    L = LH // H
    TM = x_ref.shape[1]
    assert TM % n_sub == 0
    TS = TM // n_sub

    # Layer 0 over the whole tile (K=4 matmul is cheap); fused bf16 ReLU epilogue
    # (bias already folded, v6e/v7x VPUs handle bf16 -> halves the ReLU/store traffic).
    h0 = jnp.dot(w0a_ref[...], x_ref[...], preferred_element_type=jnp.float32)
    h0 = jnp.maximum(h0.astype(bf16), 0)

    wblk = wblk_ref[...]
    bstk = bstk_ref[...]
    zeros_top = jnp.zeros((H, TS), bf16)
    carry = jnp.zeros(((L - 1) * H, TS), bf16)   # slabs 1..L-1 of the pipeline state

    h_final = []
    # Static unroll: n_sub sub-tiles + (L-1) drain iterations. Slab s of `p` holds the
    # activation entering hidden layer s+1 for sub-tile (j - s).
    for j in range(n_sub + L - 1):
        top = h0[:, j * TS:(j + 1) * TS] if j < n_sub else zeros_top
        p = jnp.concatenate([top, carry], axis=0)                      # (L*H, TS) bf16
        acc = jnp.dot(wblk, p, preferred_element_type=jnp.float32)     # (L*H, TS) f32
        # Fused epilogue: f32 bias add, bf16 cast, bf16 ReLU (one activation copy).
        z = jnp.maximum((acc + bstk).astype(bf16), 0)
        if j >= L - 1:
            h_final.append(z[(L - 1) * H:, :])                         # last hidden out
        carry = z[:(L - 1) * H, :]                                     # shift down 1 slab

    h_last = jnp.concatenate(h_final, axis=1)                          # (H, TM) bf16
    out = jnp.dot(wo_ref[...], h_last, preferred_element_type=jnp.float32) + bo_ref[...]
    out_ref[...] = out.astype(out_ref.dtype)


# ---------------------------------------------------------------------------
# Wrapper
# ---------------------------------------------------------------------------

def _tpu_generation():
    try:
        kind = jax.devices()[0].device_kind.lower()
    except Exception:
        return 0
    if "v7" in kind or "7x" in kind:
        return 7
    if "v6" in kind or "trillium" in kind:
        return 6
    if "v5" in kind:
        return 5
    if "v4" in kind:
        return 4
    return 0


def _pick_tile(n, *, tm_max, multiple, even_steps=False):
    """Large tiles amortize the ~0.35us per-grid-step overhead; keep >=2 grid steps
    when there is enough work, and prefer an even step count on v7x (2 TensorCores)."""
    units = max(1, pl.cdiv(n, multiple))
    per_step = max(1, pl.cdiv(units, 2))
    tm = min(tm_max, per_step * multiple)
    if even_steps:
        steps = pl.cdiv(n, tm)
        if steps > 1 and steps % 2 == 1:
            steps += 1
            tm = max(multiple, min(tm_max, pl.cdiv(pl.cdiv(n, steps), multiple) * multiple))
    return tm


def occnet_pallas(pts, params, *, tm=None, mode=None):
    """pts: (..., 3) -> (...,) float32, matching OccNet.forward."""
    w0, b0, wh, bh, wo, bo = params
    H = w0.shape[1]
    L = wh.shape[0]

    gen = _tpu_generation()
    is_v7x = gen >= 7
    if mode is None:
        mode = "blockdiag" if (gen >= 6 and L >= 2) else "simple"
    if mode == "blockdiag" and L < 2:
        mode = "simple"

    lead_shape = pts.shape[:-1]
    x = pts.reshape(-1, 3).astype(jnp.float32)
    n = x.shape[0]

    if tm is None:
        if mode == "blockdiag":
            tm_max = 8192 if is_v7x else 16384      # v7x has only 64 MiB VMEM
            tm = _pick_tile(n, tm_max=tm_max, multiple=1024, even_steps=is_v7x)
        else:
            tm = _pick_tile(n, tm_max=16384, multiple=512, even_steps=is_v7x)

    n_pad = pl.cdiv(n, tm) * tm
    bf16 = jnp.bfloat16

    # Feature-major input tile with a ones row (folds the layer-0 bias into the matmul).
    xt = x.T                                                    # (3, n)
    if n_pad != n:
        xt = jnp.pad(xt, ((0, 0), (0, n_pad - n)))
    x_aug = jnp.concatenate([xt, jnp.ones((1, n_pad), xt.dtype)], axis=0).astype(bf16)

    # bf16 matmul operands (cast once here); biases stay f32 for the f32 accumulation.
    w0a = jnp.concatenate([w0.T, b0.reshape(H, 1)], axis=1).astype(bf16)   # (H, 4)
    wo_t = wo.T.astype(bf16)                                               # (1, H)
    bo_t = bo.reshape(1, 1).astype(jnp.float32)                            # (1, 1)

    grid = (n_pad // tm,)
    vmem_limit = (40 << 20) if is_v7x else (64 << 20)
    flops = 2 * n_pad * (4 * H + L * H * H + H)
    bytes_accessed = (x_aug.size * 2 + n_pad * 4
                      + (H * 4 + L * H * H + H) * 2 + (L * H + 1) * 4)
    compiler_params = pltpu.CompilerParams(
        dimension_semantics=("parallel",), vmem_limit_bytes=vmem_limit)
    cost = pl.CostEstimate(flops=int(flops), transcendentals=0,
                           bytes_accessed=int(bytes_accessed))
    out_specs = pl.BlockSpec((1, tm), lambda i: (0, i))          # lane-dense output

    if mode == "blockdiag":
        n_sub = tm // 1024 if tm % 1024 == 0 else 1
        # Block-diagonal stack of per-layer W^T and stacked hidden biases.
        wblk = jnp.zeros((L * H, L * H), jnp.float32)
        for s in range(L):
            wblk = wblk.at[s * H:(s + 1) * H, s * H:(s + 1) * H].set(wh[s].T)
        wblk = wblk.astype(bf16)
        bstk = jnp.transpose(bh, (0, 2, 1)).reshape(L * H, 1).astype(jnp.float32)

        kernel = functools.partial(occnet_kernel_blockdiag, n_sub=n_sub)
        out = pl.pallas_call(
            kernel,
            out_shape=jax.ShapeDtypeStruct((1, n_pad), jnp.float32),
            grid_spec=pltpu.PrefetchScalarGridSpec(
                num_scalar_prefetch=0,
                grid=grid,
                in_specs=[
                    pl.BlockSpec((4, tm), lambda i: (0, i)),          # [x; 1] tile
                    pl.BlockSpec((H, 4), lambda i: (0, 0)),           # [w0^T | b0]
                    pl.BlockSpec((L * H, L * H), lambda i: (0, 0)),   # block-diag W^T
                    pl.BlockSpec((L * H, 1), lambda i: (0, 0)),       # stacked biases
                    pl.BlockSpec((1, H), lambda i: (0, 0)),           # w_out^T
                    pl.BlockSpec((1, 1), lambda i: (0, 0)),           # b_out
                ],
                out_specs=out_specs,
            ),
            compiler_params=compiler_params,
            cost_estimate=cost,
        )(x_aug, w0a, wblk, bstk, wo_t, bo_t)
    else:
        wh_t = jnp.transpose(wh, (0, 2, 1)).astype(bf16)               # (L, H, H)
        bh_t = jnp.transpose(bh, (0, 2, 1)).astype(jnp.float32)        # (L, H, 1)
        out = pl.pallas_call(
            occnet_kernel_simple,
            out_shape=jax.ShapeDtypeStruct((1, n_pad), jnp.float32),
            grid_spec=pltpu.PrefetchScalarGridSpec(
                num_scalar_prefetch=0,
                grid=grid,
                in_specs=[
                    pl.BlockSpec((4, tm), lambda i: (0, i)),           # [x; 1] tile
                    pl.BlockSpec((H, 4), lambda i: (0, 0)),            # [w0^T | b0]
                    pl.BlockSpec((L, H, H), lambda i: (0, 0, 0)),      # hidden W^T stack
                    pl.BlockSpec((L, H, 1), lambda i: (0, 0, 0)),      # hidden b stack
                    pl.BlockSpec((1, H), lambda i: (0, 0)),            # w_out^T
                    pl.BlockSpec((1, 1), lambda i: (0, 0)),            # b_out
                ],
                out_specs=out_specs,
            ),
            compiler_params=compiler_params,
            cost_estimate=cost,
        )(x_aug, w0a, wh_t, bh_t, wo_t, bo_t)

    return out[0, :n].reshape(lead_shape)                       # drop padding, squeeze(-1)


# ---------------------------------------------------------------------------
# Parameter init and references
# ---------------------------------------------------------------------------

def init_occnet_params(key, size_h=64, n_hidden=4):
    """Deterministic init mimicking nn.Linear default (uniform +-1/sqrt(fan_in))."""
    keys = jax.random.split(key, 2 * (n_hidden + 2))

    def linear(kw, kb, fan_in, fan_out):
        bound = 1.0 / jnp.sqrt(fan_in)
        w = jax.random.uniform(kw, (fan_in, fan_out), jnp.float32, -bound, bound)
        b = jax.random.uniform(kb, (1, fan_out), jnp.float32, -bound, bound)
        return w, b

    w0, b0 = linear(keys[0], keys[1], 3, size_h)
    wh_list, bh_list = [], []
    for i in range(n_hidden):
        w, b = linear(keys[2 + 2 * i], keys[3 + 2 * i], size_h, size_h)
        wh_list.append(w)
        bh_list.append(b)
    wh = jnp.stack(wh_list, axis=0)          # (n_hidden, H, H)
    bh = jnp.stack(bh_list, axis=0)          # (n_hidden, 1, H)
    wo, bo = linear(keys[-2], keys[-1], size_h, 1)
    return (w0, b0, wh, bh, wo, bo)


def occnet_reference(pts, params):
    """Pure-JAX f32 reference of OccNet.forward."""
    w0, b0, wh, bh, wo, bo = params
    h = jnp.maximum(pts @ w0 + b0, 0.0)
    for i in range(wh.shape[0]):
        h = jnp.maximum(h @ wh[i] + bh[i], 0.0)
    return (h @ wo + bo)[..., 0]


def occnet_reference_bf16(pts, params):
    """Reference emulating the kernel numerics (bf16 operands, folded layer-0 bias,
    f32 accumulation, f32 hidden/output bias adds)."""
    w0, b0, wh, bh, wo, bo = params
    bf = lambda a: a.astype(jnp.bfloat16)
    x = pts.reshape(-1, 3)
    x_aug = jnp.concatenate([x, jnp.ones((x.shape[0], 1), x.dtype)], axis=1)
    w0a = jnp.concatenate([w0, b0.reshape(1, -1)], axis=0)          # (4, H)
    h = jnp.maximum(jnp.dot(bf(x_aug), bf(w0a), preferred_element_type=jnp.float32), 0.0)
    for i in range(wh.shape[0]):
        h = jnp.maximum(jnp.dot(bf(h), bf(wh[i]),
                                preferred_element_type=jnp.float32) + bh[i], 0.0)
    out = jnp.dot(bf(h), bf(wo), preferred_element_type=jnp.float32) + bo
    return out[..., 0].reshape(pts.shape[:-1])


# ---------------------------------------------------------------------------
# Demo / self-test
# ---------------------------------------------------------------------------

if __name__ == "__main__":
    key = jax.random.PRNGKey(0)
    k_param, k_pts = jax.random.split(key)

    size_h, n_hidden = 64, 4
    params = init_occnet_params(k_param, size_h=size_h, n_hidden=n_hidden)

    # Small example: batch of 2 point clouds, 200 points each, 3D coords.
    pts = jax.random.uniform(k_pts, (2, 200, 3), jnp.float32, -1.0, 1.0)

    ref_bf16 = occnet_reference_bf16(pts, params)   # same numerics as the kernel
    ref_f32 = occnet_reference(pts, params)         # module semantics in f32

    # Exercise the auto-dispatched path plus both explicit paths.
    for mode in (None, "simple", "blockdiag"):
        out = jax.block_until_ready(occnet_pallas(pts, params, mode=mode))
        assert out.shape == pts.shape[:-1], (mode, out.shape, pts.shape[:-1])
        assert jnp.allclose(out, ref_bf16, atol=2e-2, rtol=2e-2), \
            (mode, float(jnp.max(jnp.abs(out - ref_bf16))))
        assert jnp.allclose(out, ref_f32, atol=5e-2, rtol=5e-2), \
            (mode, float(jnp.max(jnp.abs(out - ref_f32))))

    print("KERNEL_OK")
</pallas_src>

<mosaic_0001>
module attributes {stable_mosaic.version = 11 : i64} {
  func.func @occnet_kernel_simple(%arg0: i32, %arg1: memref<4x512xbf16, #tpu.memory_space<vmem>>, %arg2: memref<64x4xbf16, #tpu.memory_space<vmem>>, %arg3: memref<4x64x64xbf16, #tpu.memory_space<vmem>>, %arg4: memref<4x64x1xf32, #tpu.memory_space<vmem>>, %arg5: memref<1x64xbf16, #tpu.memory_space<vmem>>, %arg6: memref<1x1xf32, #tpu.memory_space<vmem>>, %arg7: memref<1x512xf32, #tpu.memory_space<vmem>>) attributes {dimension_semantics = [#tpu.dimension_semantics<parallel>], iteration_bounds = array<i64: 1>, scalar_prefetch = 0 : i64, scratch_operands = 0 : i64, tpu.core_type = #tpu.core_type<tc>, window_params = [{transform_indices = @transform_0, window_bounds = array<i64: 4, 512>}, {pipeline_mode = #tpu.pipeline_mode<synchronous>, transform_indices = @transform_1, window_bounds = array<i64: 64, 4>}, {pipeline_mode = #tpu.pipeline_mode<synchronous>, transform_indices = @transform_2, window_bounds = array<i64: 4, 64, 64>}, {pipeline_mode = #tpu.pipeline_mode<synchronous>, transform_indices = @transform_3, window_bounds = array<i64: 4, 64, 1>}, {pipeline_mode = #tpu.pipeline_mode<synchronous>, transform_indices = @transform_4, window_bounds = array<i64: 1, 64>}, {pipeline_mode = #tpu.pipeline_mode<synchronous>, transform_indices = @transform_5, window_bounds = array<i64: 1, 1>}, {transform_indices = @transform_6, window_bounds = array<i64: 1, 512>}]} {
    %c0 = arith.constant 0 : index
    %c0_0 = arith.constant 0 : index
    %0 = vector.load %arg2[%c0, %c0_0] : memref<64x4xbf16, #tpu.memory_space<vmem>>, vector<64x4xbf16>
    %c0_1 = arith.constant 0 : index
    %c0_2 = arith.constant 0 : index
    %1 = vector.load %arg1[%c0_1, %c0_2] : memref<4x512xbf16, #tpu.memory_space<vmem>>, vector<4x512xbf16>
    %cst = arith.constant dense<0.000000e+00> : vector<64x512xf32>
    %2 = tpu.matmul %0, %1, %cst {dimension_numbers = #tpu.dot_dimension_numbers<[1], [0], [0], [1], [0, 0, 1, 1], [], []>} : vector<64x4xbf16>, vector<4x512xbf16>, vector<64x512xf32> -> vector<64x512xf32>
    %cst_3 = arith.constant 0.000000e+00 : f32
    %3 = vector.broadcast %cst_3 : f32 to vector<64x512xf32>
    %4 = arith.maximumf %2, %3 : vector<64x512xf32>
    %5 = arith.truncf %4 : vector<64x512xf32> to vector<64x512xbf16>
    %c0_4 = arith.constant 0 : index
    %c0_5 = arith.constant 0 : index
    %c0_6 = arith.constant 0 : index
    %6 = vector.load %arg3[%c0_4, %c0_5, %c0_6] : memref<4x64x64xbf16, #tpu.memory_space<vmem>>, vector<1x64x64xbf16>
    %7 = vector.shape_cast %6 : vector<1x64x64xbf16> to vector<64x64xbf16>
    %cst_7 = arith.constant dense<0.000000e+00> : vector<64x512xf32>
    %8 = tpu.matmul %7, %5, %cst_7 {dimension_numbers = #tpu.dot_dimension_numbers<[1], [0], [0], [1], [0, 0, 1, 1], [], []>} : vector<64x64xbf16>, vector<64x512xbf16>, vector<64x512xf32> -> vector<64x512xf32>
    %c0_8 = arith.constant 0 : index
    %c0_9 = arith.constant 0 : index
    %c0_10 = arith.constant 0 : index
    %9 = vector.load %arg4[%c0_8, %c0_9, %c0_10] : memref<4x64x1xf32, #tpu.memory_space<vmem>>, vector<1x64x1xf32>
    %10 = vector.shape_cast %9 : vector<1x64x1xf32> to vector<64x1xf32>
    %11 = vector.broadcast %10 : vector<64x1xf32> to vector<64x512xf32>
    %12 = arith.addf %8, %11 : vector<64x512xf32>
    %cst_11 = arith.constant 0.000000e+00 : f32
    %13 = vector.broadcast %cst_11 : f32 to vector<64x512xf32>
    %14 = arith.maximumf %12, %13 : vector<64x512xf32>
    %15 = arith.truncf %14 : vector<64x512xf32> to vector<64x512xbf16>
    %c1 = arith.constant 1 : index
    %c0_12 = arith.constant 0 : index
    %c0_13 = arith.constant 0 : index
    %16 = vector.load %arg3[%c1, %c0_12, %c0_13] : memref<4x64x64xbf16, #tpu.memory_space<vmem>>, vector<1x64x64xbf16>
    %17 = vector.shape_cast %16 : vector<1x64x64xbf16> to vector<64x64xbf16>
    %cst_14 = arith.constant dense<0.000000e+00> : vector<64x512xf32>
    %18 = tpu.matmul %17, %15, %cst_14 {dimension_numbers = #tpu.dot_dimension_numbers<[1], [0], [0], [1], [0, 0, 1, 1], [], []>} : vector<64x64xbf16>, vector<64x512xbf16>, vector<64x512xf32> -> vector<64x512xf32>
    %c1_15 = arith.constant 1 : index
    %c0_16 = arith.constant 0 : index
    %c0_17 = arith.constant 0 : index
    %19 = vector.load %arg4[%c1_15, %c0_16, %c0_17] : memref<4x64x1xf32, #tpu.memory_space<vmem>>, vector<1x64x1xf32>
    %20 = vector.shape_cast %19 : vector<1x64x1xf32> to vector<64x1xf32>
    %21 = vector.broadcast %20 : vector<64x1xf32> to vector<64x512xf32>
    %22 = arith.addf %18, %21 : vector<64x512xf32>
    %cst_18 = arith.constant 0.000000e+00 : f32
    %23 = vector.broadcast %cst_18 : f32 to vector<64x512xf32>
    %24 = arith.maximumf %22, %23 : vector<64x512xf32>
    %25 = arith.truncf %24 : vector<64x512xf32> to vector<64x512xbf16>
    %c2 = arith.constant 2 : index
    %c0_19 = arith.constant 0 : index
    %c0_20 = arith.constant 0 : index
    %26 = vector.load %arg3[%c2, %c0_19, %c0_20] : memref<4x64x64xbf16, #tpu.memory_space<vmem>>, vector<1x64x64xbf16>
    %27 = vector.shape_cast %26 : vector<1x64x64xbf16> to vector<64x64xbf16>
    %cst_21 = arith.constant dense<0.000000e+00> : vector<64x512xf32>
    %28 = tpu.matmul %27, %25, %cst_21 {dimension_numbers = #tpu.dot_dimension_numbers<[1], [0], [0], [1], [0, 0, 1, 1], [], []>} : vector<64x64xbf16>, vector<64x512xbf16>, vector<64x512xf32> -> vector<64x512xf32>
    %c2_22 = arith.constant 2 : index
    %c0_23 = arith.constant 0 : index
    %c0_24 = arith.constant 0 : index
    %29 = vector.load %arg4[%c2_22, %c0_23, %c0_24] : memref<4x64x1xf32, #tpu.memory_space<vmem>>, vector<1x64x1xf32>
    %30 = vector.shape_cast %29 : vector<1x64x1xf32> to vector<64x1xf32>
    %31 = vector.broadcast %30 : vector<64x1xf32> to vector<64x512xf32>
    %32 = arith.addf %28, %31 : vector<64x512xf32>
    %cst_25 = arith.constant 0.000000e+00 : f32
    %33 = vector.broadcast %cst_25 : f32 to vector<64x512xf32>
    %34 = arith.maximumf %32, %33 : vector<64x512xf32>
    %35 = arith.truncf %34 : vector<64x512xf32> to vector<64x512xbf16>
    %c3 = arith.constant 3 : index
    %c0_26 = arith.constant 0 : index
    %c0_27 = arith.constant 0 : index
    %36 = vector.load %arg3[%c3, %c0_26, %c0_27] : memref<4x64x64xbf16, #tpu.memory_space<vmem>>, vector<1x64x64xbf16>
    %37 = vector.shape_cast %36 : vector<1x64x64xbf16> to vector<64x64xbf16>
    %cst_28 = arith.constant dense<0.000000e+00> : vector<64x512xf32>
    %38 = tpu.matmul %37, %35, %cst_28 {dimension_numbers = #tpu.dot_dimension_numbers<[1], [0], [0], [1], [0, 0, 1, 1], [], []>} : vector<64x64xbf16>, vector<64x512xbf16>, vector<64x512xf32> -> vector<64x512xf32>
    %c3_29 = arith.constant 3 : index
    %c0_30 = arith.constant 0 : index
    %c0_31 = arith.constant 0 : index
    %39 = vector.load %arg4[%c3_29, %c0_30, %c0_31] : memref<4x64x1xf32, #tpu.memory_space<vmem>>, vector<1x64x1xf32>
    %40 = vector.shape_cast %39 : vector<1x64x1xf32> to vector<64x1xf32>
    %41 = vector.broadcast %40 : vector<64x1xf32> to vector<64x512xf32>
    %42 = arith.addf %38, %41 : vector<64x512xf32>
    %cst_32 = arith.constant 0.000000e+00 : f32
    %43 = vector.broadcast %cst_32 : f32 to vector<64x512xf32>
    %44 = arith.maximumf %42, %43 : vector<64x512xf32>
    %45 = arith.truncf %44 : vector<64x512xf32> to vector<64x512xbf16>
    %c0_33 = arith.constant 0 : index
    %c0_34 = arith.constant 0 : index
    %46 = vector.load %arg5[%c0_33, %c0_34] : memref<1x64xbf16, #tpu.memory_space<vmem>>, vector<1x64xbf16>
    %cst_35 = arith.constant dense<0.000000e+00> : vector<1x512xf32>
    %47 = tpu.matmul %46, %45, %cst_35 {dimension_numbers = #tpu.dot_dimension_numbers<[1], [0], [0], [1], [0, 0, 1, 1], [], []>} : vector<1x64xbf16>, vector<64x512xbf16>, vector<1x512xf32> -> vector<1x512xf32>
    %c0_36 = arith.constant 0 : index
    %c0_37 = arith.constant 0 : index
    %48 = vector.load %arg6[%c0_36, %c0_37] : memref<1x1xf32, #tpu.memory_space<vmem>>, vector<1x1xf32>
    %49 = vector.broadcast %48 : vector<1x1xf32> to vector<1x512xf32>
    %50 = arith.addf %47, %49 : vector<1x512xf32>
    %c0_38 = arith.constant 0 : index
    %c0_39 = arith.constant 0 : index
    %51 = vector.load %arg7[%c0_38, %c0_39] : memref<1x512xf32, #tpu.memory_space<vmem>>, vector<1x512xf32>
    tpu.vector_store %arg7[%c0_38, %c0_39], %50 {strides = array<i32>} : memref<1x512xf32, #tpu.memory_space<vmem>>, vector<1x512xf32>,
    return
  }
  func.func @transform_0(%arg0: i32) -> (i32, i32) {
    %c0_i32 = arith.constant 0 : i32
    %c0_i32_0 = arith.constant 0 : i32
    return %c0_i32, %arg0 : i32, i32
  }
  func.func @transform_1(%arg0: i32) -> (i32, i32) {
    %c0_i32 = arith.constant 0 : i32
    %c0_i32_0 = arith.constant 0 : i32
    %c0_i32_1 = arith.constant 0 : i32
    return %c0_i32, %c0_i32_0 : i32, i32
  }
  func.func @transform_2(%arg0: i32) -> (i32, i32, i32) {
    %c0_i32 = arith.constant 0 : i32
    %c0_i32_0 = arith.constant 0 : i32
    %c0_i32_1 = arith.constant 0 : i32
    %c0_i32_2 = arith.constant 0 : i32
    return %c0_i32, %c0_i32_0, %c0_i32_1 : i32, i32, i32
  }
  func.func @transform_3(%arg0: i32) -> (i32, i32, i32) {
    %c0_i32 = arith.constant 0 : i32
    %c0_i32_0 = arith.constant 0 : i32
    %c0_i32_1 = arith.constant 0 : i32
    %c0_i32_2 = arith.constant 0 : i32
    return %c0_i32, %c0_i32_0, %c0_i32_1 : i32, i32, i32
  }
  func.func @transform_4(%arg0: i32) -> (i32, i32) {
    %c0_i32 = arith.constant 0 : i32
    %c0_i32_0 = arith.constant 0 : i32
    %c0_i32_1 = arith.constant 0 : i32
    return %c0_i32, %c0_i32_0 : i32, i32
  }
  func.func @transform_5(%arg0: i32) -> (i32, i32) {
    %c0_i32 = arith.constant 0 : i32
    %c0_i32_0 = arith.constant 0 : i32
    %c0_i32_1 = arith.constant 0 : i32
    return %c0_i32, %c0_i32_0 : i32, i32
  }
  func.func @transform_6(%arg0: i32) -> (i32, i32) {
    %c0_i32 = arith.constant 0 : i32
    %c0_i32_0 = arith.constant 0 : i32
    return %c0_i32, %arg0 : i32, i32
  }
}

</mosaic_0001>

<bundles_post_ra>
// kernel: tpu_custom_call.1
= control target key start
LH: loop header
LB: loop body
LE: loop exit
PB: predicated region body
PF: predicated region fallthrough
CT: control target
= control target key end

     0   :  { %s2274_s0 = inlined_call_operand.vmem [shape: bf16[4,512], index: 0, kind: input, shape index: {}]   ;;  %s2275_s1 = inlined_call_operand.vmem [shape: bf16[64,4], index: 1, kind: input, shape index: {}]   ;;  %s2276_s2 = inlined_call_operand.vmem [shape: bf16[4,64,64], index: 2, kind: input, shape index: {}]   ;;  %s2277_s3 = inlined_call_operand.vmem [shape: f32[4,64,1], index: 3, kind: input, shape index: {}]   ;;  %s2278_s4 = inlined_call_operand.vmem [shape: bf16[1,64], index: 4, kind: input, shape index: {}]   ;;  %s2279_s5 = inlined_call_operand.<no memory space> [shape: f32[1,1], index: 5, kind: input, shape index: {}]   ;;  %s2280_s6 = inlined_call_operand.hbm [shape: f32[1,512], index: 6, kind: output, shape index: {}]  }
   0x1   :  { %v11_v0 = vstv %s2279_s5 }
   0x2   :  { %12 = vst [vmem:[#allocation2] sm:$0x1] %v11_v0 }
   0x3   :  { %v35_v1 = vld [vmem:[%s2274_s0] sm:$0xff] }
   0x4   :  { %57 = vst [vmem:[#allocation1] ss:$4 sm:$0xff] %v35_v1 }
   0x5   :  { %13 = vsyncpa [#allocation4], 0  ;;  %vm75_vm0 = vcmask 1041408   ;;  %v1572_v7 = vld [vmem:[%s2275_s1] sm:$0xff]  ;;  %vm62_vm1 = vcmask 31744   ;;  %v1573_v11 = vld [vmem:[%s2275_s1 + $0x8] sm:$0xff] }
   0x6   :  { %v1574_v12 = vld [vmem:[%s2275_s1 + $0x10] sm:$0xff]  ;;  %v1575_v13 = vld [vmem:[%s2275_s1 + $0x18] sm:$0xff]  ;;  %v1623_v33 = vmov 0   ;;  %v260_v34 = vld [vmem:[%s2277_s3 + $0x20] sm:$0xff]  ;;  %vm324_vm2 = vcmask 523264   ;;  %vm1333_vm3 = vcmask 1040384  }
   0x7   :  { %v262_v32 = vld [vmem:[%s2277_s3 + $0x30] sm:$0xff]  ;;  %1594 = vset.pattern.permute.xlu0 %v1623_v33  ;;  %1595 = vset.pattern.permute.xlu1 %v1623_v33  ;;  %v263_v39 = vld [vmem:[%s2277_s3 + $0x38] sm:$0xff]  ;;  %v261_v40 = vld [vmem:[%s2277_s3 + $0x28] sm:$0xff]  ;;  %vm1335_vm4 = vcmask 1042434  }
   0x8   :  { %296 = vperm.xlu0 %1594, %v262_v32   ;;  %1596 = vset.pattern.permute.xlu2 %v1623_v33  ;;  %v256_v45 = vld [vmem:[%s2277_s3] sm:$0xff]  ;;  %v257_v46 = vld [vmem:[%s2277_s3 + $0x8] sm:$0xff]  ;;  %v1439_v59 = vld [vmem:[%s2277_s3 + $0x78] sm:$0xff] }
   0x9   :  { %286 = vperm.xlu1 %1595, %v260_v34   ;;  %v1436_v63 = vld [vmem:[%s2277_s3 + $0x60] sm:$0xff]  ;;  %v1435_v34 = vld [vmem:[%s2277_s3 + $0x58] sm:$0xff] }
   0xb   :  { %v58_v2 = vld.sshfl [vmem:[#allocation1] sm:$0xff pattern:$0x73625140]  ;;  %v59_v3 = vld.sshfl [vmem:[#allocation1 + $0x8] sm:$0xff pattern:$0x73625140] }
   0xc   :  { %v76_v4 = vsel %vm75_vm0, %v58_v2, 0  ;;  %v78_v5 = vsel %vm75_vm0, %v59_v3, 0  ;;  %v60_v6 = vld.sshfl [vmem:[#allocation1 + $0x10] sm:$0xff pattern:$0x73625140] }
   0xd   :  { %91 = vmatpush.bf16.msra.mxu0 %v76_v4  ;;  %120 = vmatpush.bf16.msra.mxu1 %v78_v5  ;;  %v80_v8 = vsel %vm75_vm0, %v60_v6, 0  ;;  %v61_v9 = vld.sshfl [vmem:[#allocation1 + $0x18] sm:$0xff pattern:$0x73625140] }
   0xe   :  { %149 = vmatpush.bf16.msra.mxu2 %v80_v8  ;;  %v82_v10 = vsel %vm75_vm0, %v61_v9, 0 }
   0xf   :  { %178 = vmatpush.bf16.msra.mxu3 %v82_v10 }
  0x10   :  { %1376 = vmatmul.msk.bf16.vlgmr.msra.gmra.mxu0 %vm62_vm1, %v1572_v7  ;;  %1380 = vmatmul.msk.bf16.vlgmr.msra.gmra.mxu1 %vm62_vm1, %v1572_v7 }
  0x11   :  { %1384 = vmatmul.msk.bf16.vlgmr.msra.gmra.mxu2 %vm62_vm1, %v1572_v7  ;;  %301 = vperm.xlu0 %1594, %v263_v39  }
  0x12   :  { %1388 = vmatmul.msk.bf16.vlgmr.msra.gmra.mxu3 %vm62_vm1, %v1572_v7  ;;  %291 = vperm.xlu1 %1595, %v261_v40  }
  0x19   :  { %266 = vperm.xlu0 %1594, %v256_v45  }
  0x1a   :  { %271 = vperm.xlu1 %1595, %v257_v46  }
  0x20   :  { %1377 = vmatmul.msk.bf16.gmra.mxu0 %vm62_vm1, %v1573_v11  ;;  %1381 = vmatmul.msk.bf16.gmra.mxu1 %vm62_vm1, %v1573_v11 }
  0x21   :  { %1385 = vmatmul.msk.bf16.gmra.mxu2 %vm62_vm1, %v1573_v11  ;;  %556 = vperm.xlu0 %1594, %v1439_v59   ;;  %v1530_v59 = vld [vmem:[%s2277_s3 + $0xd0] sm:$0xff] }
  0x22   :  { %1389 = vmatmul.msk.bf16.gmra.mxu3 %vm62_vm1, %v1573_v11  ;;  %541 = vperm.xlu1 %1595, %v1436_v63   ;;  %v1579_v63 = vld [vmem:[%s2276_s2 + $0x18] sm:$0xff] }
  0x2a   :  { %536 = vperm.xlu1 %1595, %v1435_v34  }
  0x30   :  { %1378 = vmatmul.msk.bf16.gmra.mxu0 %vm62_vm1, %v1574_v12  ;;  %1382 = vmatmul.msk.bf16.gmra.mxu1 %vm62_vm1, %v1574_v12 }
  0x31   :  { %1386 = vmatmul.msk.bf16.gmra.mxu2 %vm62_vm1, %v1574_v12 }
  0x32   :  { %1390 = vmatmul.msk.bf16.gmra.mxu3 %vm62_vm1, %v1574_v12 }
  0x40   :  { %1379 = vmatmul.msk.bf16.gmra.mxu0 %vm62_vm1, %v1575_v13  ;;  %1383 = vmatmul.msk.bf16.gmra.mxu1 %vm62_vm1, %v1575_v13 }
  0x41   :  { %1387 = vmatmul.msk.bf16.gmra.mxu2 %vm62_vm1, %v1575_v13 }
  0x42   :  { %1391 = vmatmul.msk.bf16.gmra.mxu3 %vm62_vm1, %v1575_v13 }
  0x7a   :  { %v297_v34 = vpop.permute.xlu0 %296 }
  0x8d   :  { %v1698_v14 = vpop.f32.mrf.mxu0  ;;  %v1700_v15 = vpop.f32.mrf.mxu1 }
  0x8e   :  { %v200_v11 = vmax.f32 %v1698_v14, 0.0  ;;  %v258_v14 = vld [vmem:[%s2277_s3 + $0x10] sm:$0xff] }
  0x8f   :  { %276 = vperm.xlu2 %1596, %v258_v14  }
  0x94   :  { %v1702_v16 = vpop.f32.mrf.mxu2 }
  0x95   :  { %v1704_v17 = vpop.f32.mrf.mxu3  ;;  %v1706_v18 = vpop.f32.mrf.mxu0  ;;  %v202_v45 = vmax.f32 %v1702_v16, 0.0  ;;  %v1438_v16 = vld [vmem:[%s2277_s3 + $0x70] sm:$0xff] }
  0x96   :  { %v1708_v19 = vpop.f32.mrf.mxu1 }
  0x9c   :  { %v1710_v20 = vpop.f32.mrf.mxu2 }
  0x9d   :  { %v1712_v21 = vpop.f32.mrf.mxu3  ;;  %v1714_v22 = vpop.f32.mrf.mxu0 }
  0x9e   :  { %v1716_v23 = vpop.f32.mrf.mxu1  ;;  %v208_v1 = vmax.f32 %v1714_v22, 0.0  ;;  %v204_v22 = vmax.f32 %v1706_v18, 0.0  ;;  %v1434_v18 = vld [vmem:[%s2277_s3 + $0x50] sm:$0xff] }
  0x9f   :  { %v209_v4 = vmax.f32 %v1716_v23, 0.0  ;;  %531 = vperm.xlu0 %1594, %v1434_v18  }
  0xa0   :  { %v232_v39 = vpack.c.bf16 %v204_v22, %v200_v11 }
  0xa4   :  { %v1718_v24 = vpop.f32.mrf.mxu2 }
  0xa5   :  { %v1720_v25 = vpop.f32.mrf.mxu3  ;;  %v1722_v26 = vpop.f32.mrf.mxu0  ;;  %v210_v40 = vmax.f32 %v1718_v24, 0.0  ;;  %v259_v24 = vld [vmem:[%s2277_s3 + $0x18] sm:$0xff] }
  0xa6   :  { %v1724_v27 = vpop.f32.mrf.mxu1  ;;  %v212_v2 = vmax.f32 %v1722_v26, 0.0  ;;  %281 = vperm.xlu2 %1596, %v259_v24  }
  0xa7   :  { %v213_v5 = vmax.f32 %v1724_v27, 0.0  ;;  %v201_v27 = vmax.f32 %v1700_v15, 0.0 }
  0xa8   :  { %v236_v23 = vpack.c.bf16 %v212_v2, %v208_v1  ;;  %v1532_v1 = vld [vmem:[%s2277_s3 + $0xe0] sm:$0xff]  ;;  %v1531_v2 = vld [vmem:[%s2277_s3 + $0xd8] sm:$0xff] }
  0xa9   :  { %v237_v33 = vpack.c.bf16 %v213_v5, %v209_v4 }
  0xac   :  { %v1726_v28 = vpop.f32.mrf.mxu2 }
  0xad   :  { %v1728_v29 = vpop.f32.mrf.mxu3  ;;  %v103_v30 = vpop.f32.mrf.mxu0 }
  0xae   :  { %v132_v31 = vpop.f32.mrf.mxu1  ;;  %v216_v52 = vmax.f32 %v103_v30, 0.0  ;;  %551 = vperm.xlu2 %1596, %v1438_v16  }
  0xaf   :  { %v217_v56 = vmax.f32 %v132_v31, 0.0  ;;  %v205_v31 = vmax.f32 %v1708_v19, 0.0  ;;  %v214_v19 = vmax.f32 %v1726_v28, 0.0  ;;  %v206_v28 = vmax.f32 %v1710_v20, 0.0 }
  0xb0   :  { %v203_v20 = vmax.f32 %v1704_v17, 0.0  ;;  %v1484_v17 = vld [vmem:[%s2277_s3 + $0xa0] sm:$0xff] }
  0xb1   :  { %v234_v46 = vpack.c.bf16 %v206_v28, %v202_v45 }
  0xb4   :  { %v1736_v35 = vpop.f32.mrf.mxu2 }
  0xb5   :  { %v1738_v36 = vpop.f32.mrf.mxu3  ;;  %v105_v37 = vpop.f32.mrf.mxu0  ;;  %v218_v32 = vmax.f32 %v1736_v35, 0.0 }
  0xb6   :  { %v134_v38 = vpop.f32.mrf.mxu1  ;;  %v220_v53 = vmax.f32 %v105_v37, 0.0  ;;  %v219_v15 = vmax.f32 %v1738_v36, 0.0  ;;  %v215_v37 = vmax.f32 %v1728_v29, 0.0  ;;  %v1576_v36 = vld [vmem:[%s2276_s2] sm:$0xff]  ;;  %v238_v29 = vpack.c.bf16 %v214_v19, %v210_v40  ;;  %v302_v40 = vpop.permute.xlu0 %301 }
  0xb7   :  { %v221_v57 = vmax.f32 %v134_v38, 0.0 }
  0xb8   :  { %v240_v62 = vpack.c.bf16 %v220_v53, %v216_v52  ;;  %v1480_v52 = vld [vmem:[%s2277_s3 + $0x80] sm:$0xff] }
  0xb9   :  { %v241_v0 = vpack.c.bf16 %v221_v57, %v217_v56  ;;  %v1432_v53 = vld [vmem:[%s2277_s3 + $0x40] sm:$0xff]  ;;  %v1578_v56 = vld [vmem:[%s2276_s2 + $0x10] sm:$0xff]  ;;  %v1487_v57 = vld [vmem:[%s2277_s3 + $0xb8] sm:$0xff] }
  0xbc   :  { %v1746_v41 = vpop.f32.mrf.mxu2 }
  0xbd   :  { %v1748_v42 = vpop.f32.mrf.mxu3  ;;  %v108_v43 = vpop.f32.mrf.mxu0  ;;  %v222_v12 = vmax.f32 %v1746_v41, 0.0  ;;  %v233_v41 = vpack.c.bf16 %v205_v31, %v201_v27 }
  0xbe   :  { %v137_v44 = vpop.f32.mrf.mxu1  ;;  %v224_v47 = vmax.f32 %v108_v43, 0.0  ;;  %v223_v26 = vmax.f32 %v1748_v42, 0.0  ;;  %v211_v42 = vmax.f32 %v1720_v25, 0.0  ;;  %v207_v43 = vmax.f32 %v1712_v21, 0.0  ;;  %v1433_v25 = vld [vmem:[%s2277_s3 + $0x48] sm:$0xff]  ;;  %v1486_v21 = vld [vmem:[%s2277_s3 + $0xb0] sm:$0xff] }
  0xbf   :  { %v225_v49 = vmax.f32 %v137_v44, 0.0  ;;  %v242_v35 = vpack.c.bf16 %v222_v12, %v218_v32  ;;  %526 = vperm.xlu0 %1594, %v1433_v25   ;;  %805 = vperm.xlu1 %1595, %v1486_v21  }
  0xc0   :  { %v243_v38 = vpack.c.bf16 %v223_v26, %v219_v15  ;;  %v239_v44 = vpack.c.bf16 %v215_v37, %v211_v42  ;;  %v1904_v15 = vpop.permute.xlu1 %286 }
  0xc4   :  { %v166_v48 = vpop.f32.mrf.mxu2 }
  0xc5   :  { %v195_v50 = vpop.f32.mrf.mxu3  ;;  %v110_v51 = vpop.f32.mrf.mxu0  ;;  %v226_v6 = vmax.f32 %v166_v48, 0.0  ;;  %v1485_v48 = vld [vmem:[%s2277_s3 + $0xa8] sm:$0xff] }
  0xc6   :  { %v228_v54 = vmax.f32 %v110_v51, 0.0  ;;  %v139_v55 = vpop.f32.mrf.mxu1  ;;  %v227_v9 = vmax.f32 %v195_v50, 0.0  ;;  %v1437_v50 = vld [vmem:[%s2277_s3 + $0x68] sm:$0xff]  ;;  %v1483_v51 = vld [vmem:[%s2277_s3 + $0x98] sm:$0xff] }
  0xc7   :  { %v229_v58 = vmax.f32 %v139_v55, 0.0  ;;  %795 = vperm.xlu0 %1594, %v1484_v17   ;;  %800 = vperm.xlu1 %1595, %v1485_v48   ;;  %v1535_v55 = vld [vmem:[%s2277_s3 + $0xf8] sm:$0xff] }
  0xc8   :  { %v244_v60 = vpack.c.bf16 %v228_v54, %v224_v47  ;;  %v235_v47 = vpack.c.bf16 %v207_v43, %v203_v20  ;;  %546 = vperm.xlu2 %1596, %v1437_v50   ;;  %v1534_v54 = vld [vmem:[%s2277_s3 + $0xf0] sm:$0xff]  ;;  %v292_v42 = vpop.permute.xlu1 %291 }
  0xc9   :  { %v245_v61 = vpack.c.bf16 %v229_v58, %v225_v49  ;;  %v1577_v49 = vld [vmem:[%s2276_s2 + $0x8] sm:$0xff] }
  0xca   :  { %341 = vmatpush.bf16.msrb.mxu0 %v244_v60  ;;  %v1533_v58 = vld [vmem:[%s2277_s3 + $0xe8] sm:$0xff]  ;;  %v1482_v60 = vld [vmem:[%s2277_s3 + $0x90] sm:$0xff] }
  0xcb   :  { %370 = vmatpush.bf16.msrb.mxu1 %v245_v61  ;;  %v1528_v61 = vld [vmem:[%s2277_s3 + $0xc0] sm:$0xff] }
  0xcc   :  { %v168_v3 = vpop.f32.mrf.mxu2 }
  0xcd   :  { %v230_v7 = vmax.f32 %v168_v3, 0.0  ;;  %v197_v8 = vpop.f32.mrf.mxu3  ;;  %v1264_v3 = vld [vmem:[#allocation2] sm:$0x1] }
  0xce   :  { %v231_v10 = vmax.f32 %v197_v8, 0.0  ;;  %342 = vmatpush.bf16.msrb.mxu0 %v240_v62  ;;  %v1529_v62 = vld [vmem:[%s2277_s3 + $0xc8] sm:$0xff] }
  0xcf   :  { %371 = vmatpush.bf16.msrb.mxu1 %v241_v0  ;;  %v246_v13 = vpack.c.bf16 %v230_v7, %v226_v6  ;;  %790 = vperm.xlu0 %1594, %v1483_v51   ;;  %v1481_v0 = vld [vmem:[%s2277_s3 + $0x88] sm:$0xff]  ;;  %s1351_s3 = sshll.u32 %s2280_s6, 4  ;;  %s1352_s3 = int_to_ptr.hbm [resolvable:$true] %s1351_s3 }
  0xd0   :  { %v247_v30 = vpack.c.bf16 %v231_v10, %v227_v9  ;;  %775 = vperm.xlu1 %1595, %v1480_v52   ;;  %521 = vperm.xlu2 %1596, %v1432_v53  }
  0xd1   :  { %399 = vmatpush.bf16.msrb.mxu2 %v246_v13 }
  0xd2   :  { %428 = vmatpush.bf16.msrb.mxu3 %v247_v30  ;;  %343 = vmatpush.bf16.msrb.mxu0 %v236_v23 }
  0xd3   :  { %372 = vmatpush.bf16.msrb.mxu1 %v237_v33 }
  0xd5   :  { %400 = vmatpush.bf16.msrb.mxu2 %v242_v35 }
  0xd6   :  { %429 = vmatpush.bf16.msrb.mxu3 %v243_v38  ;;  %344 = vmatpush.bf16.msrb.mxu0 %v232_v39 }
  0xd7   :  { %373 = vmatpush.bf16.msrb.mxu1 %v233_v41  ;;  %1059 = vperm.xlu0 %1594, %v1534_v54  }
  0xd8   :  { %1064 = vperm.xlu1 %1595, %v1535_v55   ;;  %810 = vperm.xlu2 %1596, %v1487_v57  }
  0xd9   :  { %401 = vmatpush.bf16.msrb.mxu2 %v238_v29  ;;  %1408 = vmatmul.msk.bf16.vlgmr.msrb.gmra.mxu0 %vm324_vm2, %v1576_v36 }
  0xda   :  { %430 = vmatpush.bf16.msrb.mxu3 %v239_v44  ;;  %1412 = vmatmul.msk.bf16.vlgmr.msrb.gmra.mxu1 %vm324_vm2, %v1576_v36 }
  0xdd   :  { %402 = vmatpush.bf16.msrb.mxu2 %v234_v46 }
  0xde   :  { %431 = vmatpush.bf16.msrb.mxu3 %v235_v47 }
  0xdf   :  { %1054 = vperm.xlu0 %1594, %v1533_v58  }
  0xe0   :  { %1416 = vmatmul.msk.bf16.vlgmr.msrb.gmra.mxu2 %vm324_vm2, %v1576_v36  ;;  %1039 = vperm.xlu1 %1595, %v1530_v59  }
  0xe1   :  { %1420 = vmatmul.msk.bf16.vlgmr.msrb.gmra.mxu3 %vm324_vm2, %v1576_v36  ;;  %785 = vperm.xlu2 %1596, %v1482_v60  }
  0xe7   :  { %1029 = vperm.xlu0 %1594, %v1528_v61  }
  0xe8   :  { %1034 = vperm.xlu1 %1595, %v1529_v62   ;;  %v1916_v62 = vpop.permute.xlu0 %266 }
  0xe9   :  { %1409 = vmatmul.msk.bf16.gmra.mxu0 %vm324_vm2, %v1577_v49  ;;  %780 = vperm.xlu2 %1596, %v1481_v0   ;;  %v1910_v39 = vpop.permute.xlu2 %276  ;;  %v272_v0 = vpop.permute.xlu1 %271 }
  0xea   :  { %1413 = vmatmul.msk.bf16.gmra.mxu1 %vm324_vm2, %v1577_v49 }
  0xf0   :  { %1417 = vmatmul.msk.bf16.gmra.mxu2 %vm324_vm2, %v1577_v49 }
  0xf1   :  { %1421 = vmatmul.msk.bf16.gmra.mxu3 %vm324_vm2, %v1577_v49  ;;  %1049 = vperm.xlu2 %1596, %v1532_v1  }
  0xf9   :  { %1410 = vmatmul.msk.bf16.gmra.mxu0 %vm324_vm2, %v1578_v56  ;;  %1044 = vperm.xlu2 %1596, %v1531_v2  }
  0xfa   :  { %1414 = vmatmul.msk.bf16.gmra.mxu1 %vm324_vm2, %v1578_v56 }
 0x100   :  { %1418 = vmatmul.msk.bf16.gmra.mxu2 %vm324_vm2, %v1578_v56  ;;  %v282_v50 = vpop.permute.xlu2 %281 }
 0x101   :  { %1422 = vmatmul.msk.bf16.gmra.mxu3 %vm324_vm2, %v1578_v56  ;;  %1267 = vperm.xlu2 %1596, %v1264_v3  }
 0x109   :  { %1411 = vmatmul.msk.bf16.gmra.mxu0 %vm324_vm2, %v1579_v63 }
 0x10a   :  { %1415 = vmatmul.msk.bf16.gmra.mxu1 %vm324_vm2, %v1579_v63 }
 0x110   :  { %1419 = vmatmul.msk.bf16.gmra.mxu2 %vm324_vm2, %v1579_v63 }
 0x111   :  { %1423 = vmatmul.msk.bf16.gmra.mxu3 %vm324_vm2, %v1579_v63 }
 0x156   :  { %v346_v4 = vpop.f32.mrf.mxu0 }
 0x157   :  { %v1882_v5 = vpop.f32.mrf.mxu1  ;;  %v347_v1 = vadd.f32 %v346_v4, %v1916_v62 }
 0x158   :  { %v376_v3 = vadd.f32 %v1882_v5, %v1916_v62 }
 0x15e   :  { %v1884_v6 = vpop.f32.mrf.mxu0 }
 0x15f   :  { %v1886_v7 = vpop.f32.mrf.mxu1 }
 0x163   :  { %v1888_v8 = vpop.f32.mrf.mxu2 }
 0x164   :  { %v1890_v9 = vpop.f32.mrf.mxu3 }
 0x166   :  { %v351_v10 = vpop.f32.mrf.mxu0 }
 0x167   :  { %v380_v11 = vpop.f32.mrf.mxu1  ;;  %v352_v54 = vadd.f32 %v351_v10, %v1910_v39  ;;  %v349_v10 = vadd.f32 %v1884_v6, %v272_v0 }
 0x168   :  { %v381_v58 = vadd.f32 %v380_v11, %v1910_v39  ;;  %v378_v11 = vadd.f32 %v1886_v7, %v272_v0 }
 0x16b   :  { %v1892_v12 = vpop.f32.mrf.mxu2 }
 0x16c   :  { %v1894_v13 = vpop.f32.mrf.mxu3 }
 0x16e   :  { %v353_v22 = vpop.f32.mrf.mxu0 }
 0x16f   :  { %v382_v26 = vpop.f32.mrf.mxu1  ;;  %v354_v55 = vadd.f32 %v353_v22, %v282_v50  ;;  %v461_v22 = vmax.f32 %v352_v54, 0.0 }
 0x170   :  { %v383_v59 = vadd.f32 %v382_v26, %v282_v50  ;;  %v462_v26 = vmax.f32 %v381_v58, 0.0 }
 0x173   :  { %v1896_v30 = vpop.f32.mrf.mxu2 }
 0x174   :  { %v1898_v23 = vpop.f32.mrf.mxu3 }
 0x176   :  { %v356_v27 = vpop.f32.mrf.mxu0 }
 0x177   :  { %v385_v31 = vpop.f32.mrf.mxu1  ;;  %v357_v43 = vadd.f32 %v356_v27, %v1904_v15  ;;  %v465_v27 = vmax.f32 %v354_v55, 0.0  ;;  %v405_v55 = vadd.f32 %v1888_v8, %v1916_v62  ;;  %v1581_v8 = vld [vmem:[%s2276_s2 + $0x28] sm:$0xff] }
 0x178   :  { %v386_v24 = vadd.f32 %v385_v31, %v1904_v15  ;;  %v466_v31 = vmax.f32 %v383_v59, 0.0 }
 0x179   :  { %v469_v17 = vmax.f32 %v357_v43, 0.0  ;;  %v458_v43 = vmax.f32 %v378_v11, 0.0 }
 0x17a   :  { %v470_v51 = vmax.f32 %v386_v24, 0.0  ;;  %v490_v6 = vpack.c.bf16 %v466_v31, %v462_v26 }
 0x17b   :  { %v1900_v32 = vpop.f32.mrf.mxu2 }
 0x17c   :  { %v1902_v33 = vpop.f32.mrf.mxu3 }
 0x17e   :  { %v358_v14 = vpop.f32.mrf.mxu0 }
 0x17f   :  { %v387_v18 = vpop.f32.mrf.mxu1  ;;  %v359_v44 = vadd.f32 %v358_v14, %v292_v42  ;;  %v453_v14 = vmax.f32 %v347_v1, 0.0 }
 0x180   :  { %v388_v45 = vadd.f32 %v387_v18, %v292_v42 }
 0x181   :  { %v473_v48 = vmax.f32 %v359_v44, 0.0 }
 0x182   :  { %v474_v52 = vmax.f32 %v388_v45, 0.0 }
 0x183   :  { %v1906_v19 = vpop.f32.mrf.mxu2  ;;  %v493_v63 = vpack.c.bf16 %v473_v48, %v469_v17 }
 0x184   :  { %v1908_v35 = vpop.f32.mrf.mxu3  ;;  %v494_v2 = vpack.c.bf16 %v474_v52, %v470_v51  ;;  %v415_v7 = vadd.f32 %v1906_v19, %v1904_v15  ;;  %v441_v19 = vadd.f32 %v1902_v33, %v282_v50  ;;  %v407_v52 = vadd.f32 %v1892_v12, %v272_v0 }
 0x186   :  { %v361_v37 = vpop.f32.mrf.mxu0  ;;  %v468_v54 = vmax.f32 %v441_v19, 0.0  ;;  %v459_v12 = vmax.f32 %v407_v52, 0.0 }
 0x187   :  { %v390_v38 = vpop.f32.mrf.mxu1  ;;  %v362_v41 = vadd.f32 %v361_v37, %v297_v34  ;;  %v454_v37 = vmax.f32 %v376_v3, 0.0 }
 0x188   :  { %v391_v28 = vadd.f32 %v390_v38, %v297_v34  ;;  %v457_v38 = vmax.f32 %v349_v10, 0.0 }
 0x189   :  { %v477_v20 = vmax.f32 %v362_v41, 0.0 }
 0x18a   :  { %v478_v47 = vmax.f32 %v391_v28, 0.0  ;;  %v489_v28 = vpack.c.bf16 %v465_v27, %v461_v22 }
 0x18b   :  { %v416_v36 = vpop.f32.mrf.mxu2 }
 0x18c   :  { %v445_v29 = vpop.f32.mrf.mxu3  ;;  %v417_v44 = vadd.f32 %v416_v36, %v292_v42  ;;  %v412_v36 = vadd.f32 %v1900_v32, %v282_v50  ;;  %v439_v32 = vadd.f32 %v1898_v23, %v1910_v39  ;;  %v436_v50 = vadd.f32 %v1894_v13, %v272_v0 }
 0x18d   :  { %v446_v45 = vadd.f32 %v445_v29, %v292_v42  ;;  %v434_v23 = vadd.f32 %v1890_v9, %v1916_v62  ;;  %v1582_v9 = vld [vmem:[%s2276_s2 + $0x30] sm:$0xff]  ;;  %v1583_v62 = vld [vmem:[%s2276_s2 + $0x38] sm:$0xff] }
 0x18e   :  { %v363_v25 = vpop.f32.mrf.mxu0  ;;  %v475_v17 = vmax.f32 %v417_v44, 0.0  ;;  %v460_v58 = vmax.f32 %v436_v50, 0.0 }
 0x18f   :  { %v364_v21 = vadd.f32 %v363_v25, %v302_v40  ;;  %v392_v46 = vpop.f32.mrf.mxu1  ;;  %v476_v42 = vmax.f32 %v446_v45, 0.0  ;;  %v456_v13 = vmax.f32 %v434_v23, 0.0 }
 0x190   :  { %v393_v16 = vadd.f32 %v392_v46, %v302_v40  ;;  %v444_v46 = vadd.f32 %v1908_v35, %v1904_v15  ;;  %v410_v15 = vadd.f32 %v1896_v30, %v1910_v39  ;;  %v471_v35 = vmax.f32 %v415_v7, 0.0  ;;  %v1991_v7 = vpop.permute.xlu1 %541 }
 0x191   :  { %v481_v49 = vmax.f32 %v364_v21, 0.0  ;;  %v464_v39 = vmax.f32 %v439_v32, 0.0 }
 0x192   :  { %v482_v53 = vmax.f32 %v393_v16, 0.0  ;;  %v485_v16 = vpack.c.bf16 %v457_v38, %v453_v14  ;;  %v472_v51 = vmax.f32 %v444_v46, 0.0  ;;  %v495_v33 = vpack.c.bf16 %v475_v17, %v471_v35 }
 0x193   :  { %v497_v56 = vpack.c.bf16 %v481_v49, %v477_v20  ;;  %v419_v57 = vpop.f32.mrf.mxu2  ;;  %v486_v49 = vpack.c.bf16 %v458_v43, %v454_v37  ;;  %v492_v59 = vpack.c.bf16 %v468_v54, %v464_v39 }
 0x194   :  { %v498_v60 = vpack.c.bf16 %v482_v53, %v478_v47  ;;  %v448_v61 = vpop.f32.mrf.mxu3  ;;  %v420_v18 = vadd.f32 %v419_v57, %v297_v34  ;;  %v467_v53 = vmax.f32 %v412_v36, 0.0  ;;  %v496_v30 = vpack.c.bf16 %v476_v42, %v472_v51 }
 0x195   :  { %595 = vmatpush.bf16.msra.mxu0 %v497_v56  ;;  %v449_v4 = vadd.f32 %v448_v61, %v297_v34  ;;  %v463_v56 = vmax.f32 %v410_v15, 0.0 }
 0x196   :  { %624 = vmatpush.bf16.msra.mxu1 %v498_v60  ;;  %v479_v20 = vmax.f32 %v420_v18, 0.0  ;;  %v455_v60 = vmax.f32 %v405_v55, 0.0 }
 0x197   :  { %v480_v34 = vmax.f32 %v449_v4, 0.0  ;;  %v491_v57 = vpack.c.bf16 %v467_v53, %v463_v56 }
 0x198   :  { %v487_v61 = vpack.c.bf16 %v459_v12, %v455_v60  ;;  %v2008_v32 = vpop.permute.xlu1 %536 }
 0x199   :  { %596 = vmatpush.bf16.msra.mxu0 %v493_v63  ;;  %v488_v63 = vpack.c.bf16 %v460_v58, %v456_v13 }
 0x19a   :  { %625 = vmatpush.bf16.msra.mxu1 %v494_v2 }
 0x19b   :  { %v421_v41 = vpop.f32.mrf.mxu2 }
 0x19c   :  { %v422_v5 = vadd.f32 %v421_v41, %v302_v40  ;;  %v450_v24 = vpop.f32.mrf.mxu3 }
 0x19d   :  { %v451_v25 = vadd.f32 %v450_v24, %v302_v40  ;;  %597 = vmatpush.bf16.msra.mxu0 %v489_v28  ;;  %v1580_v40 = vld [vmem:[%s2276_s2 + $0x20] sm:$0xff] }
 0x19e   :  { %v483_v21 = vmax.f32 %v422_v5, 0.0  ;;  %626 = vmatpush.bf16.msra.mxu1 %v490_v6  ;;  %v1985_v5 = vpop.permute.xlu0 %556  ;;  %v1989_v6 = vpop.permute.xlu2 %551 }
 0x19f   :  { %v484_v47 = vmax.f32 %v451_v25, 0.0 }
 0x1a0   :  { %v499_v48 = vpack.c.bf16 %v483_v21, %v479_v20 }
 0x1a1   :  { %v500_v29 = vpack.c.bf16 %v484_v47, %v480_v34  ;;  %598 = vmatpush.bf16.msra.mxu0 %v485_v16 }
 0x1a2   :  { %627 = vmatpush.bf16.msra.mxu1 %v486_v49  ;;  %653 = vmatpush.bf16.msra.mxu2 %v499_v48 }
 0x1a3   :  { %682 = vmatpush.bf16.msra.mxu3 %v500_v29 }
 0x1a4   :  { %1456 = vmatmul.msk.bf16.vlgmr.msra.gmra.mxu0 %vm324_vm2, %v1580_v40 }
 0x1a5   :  { %1460 = vmatmul.msk.bf16.vlgmr.msra.gmra.mxu1 %vm324_vm2, %v1580_v40 }
 0x1a6   :  { %654 = vmatpush.bf16.msra.mxu2 %v495_v33  ;;  %v1997_v46 = vpop.permute.xlu0 %531  ;;  %v2000_v47 = vpop.permute.xlu2 %546 }
 0x1a7   :  { %683 = vmatpush.bf16.msra.mxu3 %v496_v30 }
 0x1aa   :  { %655 = vmatpush.bf16.msra.mxu2 %v491_v57 }
 0x1ab   :  { %684 = vmatpush.bf16.msra.mxu3 %v492_v59 }
 0x1ae   :  { %656 = vmatpush.bf16.msra.mxu2 %v487_v61  ;;  %v2014_v57 = vpop.permute.xlu0 %526 }
 0x1af   :  { %685 = vmatpush.bf16.msra.mxu3 %v488_v63  ;;  %v522_v63 = vpop.permute.xlu2 %521 }
 0x1b1   :  { %1464 = vmatmul.msk.bf16.vlgmr.msra.gmra.mxu2 %vm324_vm2, %v1580_v40 }
 0x1b2   :  { %1468 = vmatmul.msk.bf16.vlgmr.msra.gmra.mxu3 %vm324_vm2, %v1580_v40 }
 0x1b4   :  { %1457 = vmatmul.msk.bf16.gmra.mxu0 %vm324_vm2, %v1581_v8 }
 0x1b5   :  { %1461 = vmatmul.msk.bf16.gmra.mxu1 %vm324_vm2, %v1581_v8 }
 0x1c1   :  { %1465 = vmatmul.msk.bf16.gmra.mxu2 %vm324_vm2, %v1581_v8 }
 0x1c2   :  { %1469 = vmatmul.msk.bf16.gmra.mxu3 %vm324_vm2, %v1581_v8 }
 0x1c4   :  { %1458 = vmatmul.msk.bf16.gmra.mxu0 %vm324_vm2, %v1582_v9 }
 0x1c5   :  { %1462 = vmatmul.msk.bf16.gmra.mxu1 %vm324_vm2, %v1582_v9 }
 0x1d1   :  { %1466 = vmatmul.msk.bf16.gmra.mxu2 %vm324_vm2, %v1582_v9 }
 0x1d2   :  { %1470 = vmatmul.msk.bf16.gmra.mxu3 %vm324_vm2, %v1582_v9 }
 0x1d4   :  { %1459 = vmatmul.msk.bf16.gmra.mxu0 %vm324_vm2, %v1583_v62 }
 0x1d5   :  { %1463 = vmatmul.msk.bf16.gmra.mxu1 %vm324_vm2, %v1583_v62 }
 0x1e1   :  { %1467 = vmatmul.msk.bf16.gmra.mxu2 %vm324_vm2, %v1583_v62 }
 0x1e2   :  { %1471 = vmatmul.msk.bf16.gmra.mxu3 %vm324_vm2, %v1583_v62 }
 0x221   :  { %v1967_v0 = vpop.f32.mrf.mxu0 }
 0x222   :  { %v1969_v1 = vpop.f32.mrf.mxu1 }
 0x229   :  { %v602_v2 = vpop.f32.mrf.mxu0 }
 0x22a   :  { %v631_v3 = vpop.f32.mrf.mxu1  ;;  %v603_v60 = vadd.f32 %v602_v2, %v2014_v57 }
 0x22b   :  { %v632_v8 = vadd.f32 %v631_v3, %v2014_v57 }
 0x22d   :  { %v712_v2 = vmax.f32 %v632_v8, 0.0 }
 0x231   :  { %v605_v10 = vpop.f32.mrf.mxu0 }
 0x232   :  { %v634_v22 = vpop.f32.mrf.mxu1  ;;  %v606_v39 = vadd.f32 %v605_v10, %v1997_v46 }
 0x233   :  { %v635_v58 = vadd.f32 %v634_v22, %v1997_v46 }
 0x234   :  { %v1971_v27 = vpop.f32.mrf.mxu2  ;;  %v715_v10 = vmax.f32 %v606_v39, 0.0 }
 0x235   :  { %v1973_v11 = vpop.f32.mrf.mxu3  ;;  %v659_v39 = vadd.f32 %v1971_v27, %v522_v63 }
 0x239   :  { %v607_v26 = vpop.f32.mrf.mxu0 }
 0x23a   :  { %v636_v31 = vpop.f32.mrf.mxu1  ;;  %v608_v50 = vadd.f32 %v607_v26, %v2008_v32  ;;  %v601_v26 = vadd.f32 %v1967_v0, %v522_v63 }
 0x23b   :  { %v637_v55 = vadd.f32 %v636_v31, %v2008_v32 }
 0x23c   :  { %v1975_v14 = vpop.f32.mrf.mxu2  ;;  %v719_v13 = vmax.f32 %v608_v50, 0.0 }
 0x23d   :  { %v1977_v18 = vpop.f32.mrf.mxu3  ;;  %v720_v9 = vmax.f32 %v637_v55, 0.0 }
 0x241   :  { %v610_v37 = vpop.f32.mrf.mxu0 }
 0x242   :  { %v639_v38 = vpop.f32.mrf.mxu1  ;;  %v611_v42 = vadd.f32 %v610_v37, %v1991_v7  ;;  %v630_v37 = vadd.f32 %v1969_v1, %v522_v63 }
 0x243   :  { %v640_v51 = vadd.f32 %v639_v38, %v1991_v7  ;;  %v716_v38 = vmax.f32 %v635_v58, 0.0 }
 0x244   :  { %v1979_v4 = vpop.f32.mrf.mxu2  ;;  %v723_v12 = vmax.f32 %v611_v42, 0.0 }
 0x245   :  { %v1981_v41 = vpop.f32.mrf.mxu3  ;;  %v724_v59 = vmax.f32 %v640_v51, 0.0 }
 0x249   :  { %v612_v28 = vpop.f32.mrf.mxu0 }
 0x24a   :  { %v641_v43 = vpop.f32.mrf.mxu1  ;;  %v613_v17 = vadd.f32 %v612_v28, %v2000_v47  ;;  %v711_v28 = vmax.f32 %v603_v60, 0.0 }
 0x24b   :  { %v642_v40 = vadd.f32 %v641_v43, %v2000_v47  ;;  %v743_v43 = vpack.c.bf16 %v719_v13, %v715_v10 }
 0x24c   :  { %v1983_v44 = vpop.f32.mrf.mxu2  ;;  %v727_v54 = vmax.f32 %v613_v17, 0.0 }
 0x24d   :  { %v1987_v24 = vpop.f32.mrf.mxu3  ;;  %v728_v56 = vmax.f32 %v642_v40, 0.0 }
 0x24e   :  { %v747_v61 = vpack.c.bf16 %v727_v54, %v723_v12  ;;  %v664_v54 = vadd.f32 %v1979_v4, %v1997_v46  ;;  %v688_v12 = vadd.f32 %v1973_v11, %v522_v63  ;;  %v1586_v11 = vld [vmem:[%s2276_s2 + $0x50] sm:$0xff] }
 0x24f   :  { %v748_v62 = vpack.c.bf16 %v728_v56, %v724_v59 }
 0x250   :  { %v717_v4 = vmax.f32 %v664_v54, 0.0 }
 0x251   :  { %v615_v45 = vpop.f32.mrf.mxu0 }
 0x252   :  { %v644_v25 = vpop.f32.mrf.mxu1  ;;  %v616_v34 = vadd.f32 %v615_v45, %v1989_v6  ;;  %v744_v45 = vpack.c.bf16 %v720_v9, %v716_v38 }
 0x253   :  { %v645_v16 = vadd.f32 %v644_v25, %v1989_v6  ;;  %v707_v25 = vmax.f32 %v601_v26, 0.0 }
 0x254   :  { %v1993_v20 = vpop.f32.mrf.mxu2  ;;  %v731_v29 = vmax.f32 %v616_v34, 0.0  ;;  %v708_v34 = vmax.f32 %v630_v37, 0.0 }
 0x255   :  { %v1995_v21 = vpop.f32.mrf.mxu3  ;;  %v732_v52 = vmax.f32 %v645_v16, 0.0  ;;  %v739_v3 = vpack.c.bf16 %v711_v28, %v707_v25 }
 0x256   :  { %v740_v0 = vpack.c.bf16 %v712_v2, %v708_v34 }
 0x259   :  { %v617_v36 = vpop.f32.mrf.mxu0 }
 0x25a   :  { %v618_v48 = vadd.f32 %v617_v36, %v1985_v5  ;;  %v646_v49 = vpop.f32.mrf.mxu1  ;;  %v1584_v36 = vld [vmem:[%s2276_s2 + $0x40] sm:$0xff] }
 0x25b   :  { %v647_v19 = vadd.f32 %v646_v49, %v1985_v5 }
 0x25c   :  { %v735_v15 = vmax.f32 %v618_v48, 0.0  ;;  %v670_v35 = vpop.f32.mrf.mxu2 }
 0x25d   :  { %v736_v53 = vmax.f32 %v647_v19, 0.0  ;;  %v699_v33 = vpop.f32.mrf.mxu3  ;;  %v671_v48 = vadd.f32 %v670_v35, %v2000_v47 }
 0x25e   :  { %v751_v30 = vpack.c.bf16 %v735_v15, %v731_v29  ;;  %v700_v19 = vadd.f32 %v699_v33, %v2000_v47  ;;  %v669_v29 = vadd.f32 %v1993_v20, %v1991_v7 }
 0x25f   :  { %v752_v23 = vpack.c.bf16 %v736_v53, %v732_v52  ;;  %v666_v53 = vadd.f32 %v1983_v44, %v2008_v32  ;;  %v729_v47 = vmax.f32 %v671_v48, 0.0  ;;  %v661_v44 = vadd.f32 %v1975_v14, %v2014_v57 }
 0x260   :  { %849 = vmatpush.bf16.msrb.mxu0 %v751_v30  ;;  %v730_v20 = vmax.f32 %v700_v19, 0.0  ;;  %v725_v30 = vmax.f32 %v669_v29, 0.0  ;;  %v709_v14 = vmax.f32 %v659_v39, 0.0 }
 0x261   :  { %878 = vmatpush.bf16.msrb.mxu1 %v752_v23  ;;  %v721_v55 = vmax.f32 %v666_v53, 0.0 }
 0x262   :  { %v749_v56 = vpack.c.bf16 %v729_v47, %v725_v30 }
 0x264   :  { %v673_v31 = vpop.f32.mrf.mxu2  ;;  %850 = vmatpush.bf16.msrb.mxu0 %v747_v61  ;;  %v1587_v61 = vld [vmem:[%s2276_s2 + $0x58] sm:$0xff] }
 0x265   :  { %v702_v22 = vpop.f32.mrf.mxu3  ;;  %879 = vmatpush.bf16.msrb.mxu1 %v748_v62  ;;  %v674_v16 = vadd.f32 %v673_v31, %v1989_v6 }
 0x266   :  { %v703_v1 = vadd.f32 %v702_v22, %v1989_v6  ;;  %v698_v6 = vadd.f32 %v1995_v21, %v1991_v7  ;;  %v693_v7 = vadd.f32 %v1981_v41, %v1997_v46  ;;  %v713_v41 = vmax.f32 %v661_v44, 0.0 }
 0x267   :  { %v733_v15 = vmax.f32 %v674_v16, 0.0  ;;  %v745_v46 = vpack.c.bf16 %v721_v55, %v717_v4 }
 0x268   :  { %851 = vmatpush.bf16.msrb.mxu0 %v743_v43  ;;  %v734_v52 = vmax.f32 %v703_v1, 0.0  ;;  %v726_v21 = vmax.f32 %v698_v6, 0.0  ;;  %v718_v58 = vmax.f32 %v693_v7, 0.0  ;;  %v741_v13 = vpack.c.bf16 %v713_v41, %v709_v14 }
 0x269   :  { %880 = vmatpush.bf16.msrb.mxu1 %v744_v45 }
 0x26a   :  { %v750_v23 = vpack.c.bf16 %v730_v20, %v726_v21 }
 0x26c   :  { %v675_v17 = vpop.f32.mrf.mxu2  ;;  %852 = vmatpush.bf16.msrb.mxu0 %v739_v3 }
 0x26d   :  { %v676_v49 = vadd.f32 %v675_v17, %v1985_v5  ;;  %v704_v40 = vpop.f32.mrf.mxu3  ;;  %881 = vmatpush.bf16.msrb.mxu1 %v740_v0  ;;  %v2089_v0 = vpop.permute.xlu2 %810 }
 0x26e   :  { %v705_v42 = vadd.f32 %v704_v40, %v1985_v5  ;;  %v695_v5 = vadd.f32 %v1987_v24, %v2008_v32  ;;  %v690_v24 = vadd.f32 %v1977_v18, %v2014_v57  ;;  %v1585_v18 = vld [vmem:[%s2276_s2 + $0x48] sm:$0xff]  ;;  %v710_v57 = vmax.f32 %v688_v12, 0.0 }
 0x26f   :  { %v737_v51 = vmax.f32 %v676_v49, 0.0  ;;  %1504 = vmatmul.msk.bf16.vlgmr.msrb.gmra.mxu0 %vm324_vm2, %v1584_v36  ;;  %v2095_v49 = vpop.permute.xlu0 %795 }
 0x270   :  { %v738_v35 = vmax.f32 %v705_v42, 0.0  ;;  %1508 = vmatmul.msk.bf16.vlgmr.msrb.gmra.mxu1 %vm324_vm2, %v1584_v36  ;;  %v722_v32 = vmax.f32 %v695_v5, 0.0  ;;  %v714_v59 = vmax.f32 %v690_v24, 0.0 }
 0x271   :  { %v753_v33 = vpack.c.bf16 %v737_v51, %v733_v15 }
 0x272   :  { %v754_v50 = vpack.c.bf16 %v738_v35, %v734_v52  ;;  %v746_v60 = vpack.c.bf16 %v722_v32, %v718_v58  ;;  %v742_v27 = vpack.c.bf16 %v714_v59, %v710_v57 }
 0x273   :  { %907 = vmatpush.bf16.msrb.mxu2 %v753_v33 }
 0x274   :  { %936 = vmatpush.bf16.msrb.mxu3 %v754_v50 }
 0x275   :  { %v2099_v19 = vpop.permute.xlu2 %785 }
 0x277   :  { %908 = vmatpush.bf16.msrb.mxu2 %v749_v56  ;;  %v2114_v30 = vpop.permute.xlu0 %790 }
 0x278   :  { %937 = vmatpush.bf16.msrb.mxu3 %v750_v23 }
 0x27b   :  { %909 = vmatpush.bf16.msrb.mxu2 %v745_v46 }
 0x27c   :  { %938 = vmatpush.bf16.msrb.mxu3 %v746_v60 }
 0x27d   :  { %v2120_v58 = vpop.permute.xlu2 %780 }
 0x27f   :  { %910 = vmatpush.bf16.msrb.mxu2 %v741_v13  ;;  %1505 = vmatmul.msk.bf16.gmra.mxu0 %vm324_vm2, %v1585_v18 }
 0x280   :  { %939 = vmatpush.bf16.msrb.mxu3 %v742_v27  ;;  %1509 = vmatmul.msk.bf16.gmra.mxu1 %vm324_vm2, %v1585_v18 }
 0x282   :  { %1512 = vmatmul.msk.bf16.vlgmr.msrb.gmra.mxu2 %vm324_vm2, %v1584_v36 }
 0x283   :  { %1516 = vmatmul.msk.bf16.vlgmr.msrb.gmra.mxu3 %vm324_vm2, %v1584_v36  ;;  %v2091_v36 = vpop.permute.xlu1 %805 }
 0x28b   :  { %v2102_v29 = vpop.permute.xlu1 %800 }
 0x28f   :  { %1506 = vmatmul.msk.bf16.gmra.mxu0 %vm324_vm2, %v1586_v11 }
 0x290   :  { %1510 = vmatmul.msk.bf16.gmra.mxu1 %vm324_vm2, %v1586_v11 }
 0x292   :  { %1513 = vmatmul.msk.bf16.gmra.mxu2 %vm324_vm2, %v1585_v18 }
 0x293   :  { %1517 = vmatmul.msk.bf16.gmra.mxu3 %vm324_vm2, %v1585_v18  ;;  %v2124_v57 = vpop.permute.xlu1 %775 }
 0x29f   :  { %1507 = vmatmul.msk.bf16.gmra.mxu0 %vm324_vm2, %v1587_v61 }
 0x2a0   :  { %1511 = vmatmul.msk.bf16.gmra.mxu1 %vm324_vm2, %v1587_v61 }
 0x2a2   :  { %1514 = vmatmul.msk.bf16.gmra.mxu2 %vm324_vm2, %v1586_v11 }
 0x2a3   :  { %1518 = vmatmul.msk.bf16.gmra.mxu3 %vm324_vm2, %v1586_v11 }
 0x2b2   :  { %1515 = vmatmul.msk.bf16.gmra.mxu2 %vm324_vm2, %v1587_v61 }
 0x2b3   :  { %1519 = vmatmul.msk.bf16.gmra.mxu3 %vm324_vm2, %v1587_v61 }
 0x2ec   :  { %v2073_v63 = vpop.f32.mrf.mxu0 }
 0x2ed   :  { %v2075_v8 = vpop.f32.mrf.mxu1 }
 0x2f4   :  { %v856_v9 = vpop.f32.mrf.mxu0 }
 0x2f5   :  { %v885_v62 = vpop.f32.mrf.mxu1  ;;  %v857_v59 = vadd.f32 %v856_v9, %v2120_v58 }
 0x2f6   :  { %v886_v13 = vadd.f32 %v885_v62, %v2120_v58 }
 0x2f7   :  { %v965_v9 = vmax.f32 %v857_v59, 0.0 }
 0x2fc   :  { %v859_v26 = vpop.f32.mrf.mxu0 }
 0x2fd   :  { %v888_v10 = vpop.f32.mrf.mxu1  ;;  %v860_v4 = vadd.f32 %v859_v26, %v2099_v19  ;;  %v855_v26 = vadd.f32 %v2073_v63, %v2124_v57  ;;  %v1588_v63 = vld [vmem:[%s2276_s2 + $0x60] sm:$0xff] }
 0x2fe   :  { %v889_v41 = vadd.f32 %v888_v10, %v2099_v19  ;;  %v884_v10 = vadd.f32 %v2075_v8, %v2124_v57 }
 0x300   :  { %v962_v62 = vmax.f32 %v884_v10, 0.0 }
 0x304   :  { %v861_v31 = vpop.f32.mrf.mxu0 }
 0x305   :  { %v890_v37 = vpop.f32.mrf.mxu1  ;;  %v2077_v38 = vpop.f32.mrf.mxu2  ;;  %v862_v55 = vadd.f32 %v861_v31, %v2114_v30  ;;  %v969_v31 = vmax.f32 %v860_v4, 0.0 }
 0x306   :  { %v2079_v22 = vpop.f32.mrf.mxu3  ;;  %v891_v32 = vadd.f32 %v890_v37, %v2114_v30  ;;  %v970_v37 = vmax.f32 %v889_v41, 0.0  ;;  %v913_v41 = vadd.f32 %v2077_v38, %v2124_v57 }
 0x307   :  { %v973_v60 = vmax.f32 %v862_v55, 0.0 }
 0x308   :  { %v974_v27 = vmax.f32 %v891_v32, 0.0 }
 0x30c   :  { %v864_v28 = vpop.f32.mrf.mxu0 }
 0x30d   :  { %v893_v43 = vpop.f32.mrf.mxu1  ;;  %v2081_v2 = vpop.f32.mrf.mxu2  ;;  %v865_v20 = vadd.f32 %v864_v28, %v2095_v49  ;;  %v997_v28 = vpack.c.bf16 %v973_v60, %v969_v31 }
 0x30e   :  { %v2083_v45 = vpop.f32.mrf.mxu3  ;;  %v894_v7 = vadd.f32 %v893_v43, %v2095_v49  ;;  %v966_v43 = vmax.f32 %v886_v13, 0.0 }
 0x30f   :  { %v977_v12 = vmax.f32 %v865_v20, 0.0 }
 0x310   :  { %v978_v46 = vmax.f32 %v894_v7, 0.0 }
 0x314   :  { %v866_v25 = vpop.f32.mrf.mxu0 }
 0x315   :  { %v895_v34 = vpop.f32.mrf.mxu1  ;;  %v2085_v3 = vpop.f32.mrf.mxu2  ;;  %v867_v6 = vadd.f32 %v866_v25, %v2102_v29  ;;  %v998_v25 = vpack.c.bf16 %v974_v27, %v970_v37 }
 0x316   :  { %v2087_v16 = vpop.f32.mrf.mxu3  ;;  %v896_v47 = vadd.f32 %v895_v34, %v2102_v29  ;;  %v961_v34 = vmax.f32 %v855_v26, 0.0 }
 0x317   :  { %v981_v56 = vmax.f32 %v867_v6, 0.0 }
 0x318   :  { %v982_v23 = vmax.f32 %v896_v47, 0.0 }
 0x319   :  { %v1001_v14 = vpack.c.bf16 %v981_v56, %v977_v12 }
 0x31a   :  { %v1002_v11 = vpack.c.bf16 %v982_v23, %v978_v46 }
 0x31c   :  { %v869_v1 = vpop.f32.mrf.mxu0 }
 0x31d   :  { %v898_v17 = vpop.f32.mrf.mxu1  ;;  %v2093_v48 = vpop.f32.mrf.mxu2  ;;  %v870_v42 = vadd.f32 %v869_v1, %v2091_v36  ;;  %v993_v1 = vpack.c.bf16 %v965_v9, %v961_v34 }
 0x31e   :  { %v2097_v40 = vpop.f32.mrf.mxu3  ;;  %v899_v15 = vadd.f32 %v898_v17, %v2091_v36  ;;  %v920_v55 = vadd.f32 %v2093_v48, %v2114_v30  ;;  %v915_v48 = vadd.f32 %v2081_v2, %v2120_v58 }
 0x31f   :  { %v985_v50 = vmax.f32 %v870_v42, 0.0  ;;  %v994_v42 = vpack.c.bf16 %v966_v43, %v962_v62 }
 0x320   :  { %v986_v21 = vmax.f32 %v899_v15, 0.0  ;;  %v967_v46 = vmax.f32 %v915_v48, 0.0 }
 0x324   :  { %v871_v51 = vpop.f32.mrf.mxu0 }
 0x325   :  { %v872_v52 = vadd.f32 %v871_v51, %v2089_v0  ;;  %v900_v35 = vpop.f32.mrf.mxu1  ;;  %v2107_v53 = vpop.f32.mrf.mxu2 }
 0x326   :  { %v901_v33 = vadd.f32 %v900_v35, %v2089_v0  ;;  %v2111_v5 = vpop.f32.mrf.mxu3 }
 0x327   :  { %v989_v54 = vmax.f32 %v872_v52, 0.0 }
 0x328   :  { %v990_v44 = vmax.f32 %v901_v33, 0.0 }
 0x329   :  { %v1005_v24 = vpack.c.bf16 %v989_v54, %v985_v50  ;;  %v923_v50 = vadd.f32 %v2107_v53, %v2095_v49  ;;  %v918_v53 = vadd.f32 %v2085_v3, %v2099_v19 }
 0x32a   :  { %v1006_v39 = vpack.c.bf16 %v990_v44, %v986_v21  ;;  %v952_v21 = vadd.f32 %v2111_v5, %v2095_v49  ;;  %v947_v49 = vadd.f32 %v2087_v16, %v2099_v19  ;;  %v942_v19 = vadd.f32 %v2079_v22, %v2124_v57  ;;  %v1590_v22 = vld [vmem:[%s2276_s2 + $0x70] sm:$0xff]  ;;  %v1591_v57 = vld [vmem:[%s2276_s2 + $0x78] sm:$0xff] }
 0x32b   :  { %1103 = vmatpush.bf16.msra.mxu0 %v1005_v24  ;;  %v979_v23 = vmax.f32 %v923_v50, 0.0  ;;  %v971_v16 = vmax.f32 %v918_v53, 0.0 }
 0x32c   :  { %1132 = vmatpush.bf16.msra.mxu1 %v1006_v39  ;;  %v980_v5 = vmax.f32 %v952_v21, 0.0  ;;  %v975_v39 = vmax.f32 %v920_v55, 0.0  ;;  %v972_v2 = vmax.f32 %v947_v49, 0.0 }
 0x32d   :  { %v924_v18 = vpop.f32.mrf.mxu2 }
 0x32e   :  { %v953_v61 = vpop.f32.mrf.mxu3  ;;  %v925_v52 = vadd.f32 %v924_v18, %v2102_v29  ;;  %v999_v59 = vpack.c.bf16 %v975_v39, %v971_v16 }
 0x32f   :  { %1104 = vmatpush.bf16.msra.mxu0 %v1001_v14  ;;  %v954_v33 = vadd.f32 %v953_v61, %v2102_v29  ;;  %v949_v29 = vadd.f32 %v2097_v40, %v2114_v30  ;;  %v1589_v40 = vld [vmem:[%s2276_s2 + $0x68] sm:$0xff]  ;;  %v944_v30 = vadd.f32 %v2083_v45, %v2120_v58  ;;  %v963_v45 = vmax.f32 %v913_v41, 0.0 }
 0x330   :  { %1133 = vmatpush.bf16.msra.mxu1 %v1002_v11  ;;  %v983_v56 = vmax.f32 %v925_v52, 0.0  ;;  %v964_v58 = vmax.f32 %v942_v19, 0.0  ;;  %v2205_v52 = vpop.permute.xlu2 %1049 }
 0x331   :  { %v984_v32 = vmax.f32 %v954_v33, 0.0  ;;  %v976_v3 = vmax.f32 %v949_v29, 0.0  ;;  %v968_v60 = vmax.f32 %v944_v30, 0.0  ;;  %v995_v38 = vpack.c.bf16 %v967_v46, %v963_v45 }
 0x332   :  { %v1003_v4 = vpack.c.bf16 %v983_v56, %v979_v23 }
 0x333   :  { %1105 = vmatpush.bf16.msra.mxu0 %v997_v28  ;;  %v1004_v12 = vpack.c.bf16 %v984_v32, %v980_v5  ;;  %v1000_v14 = vpack.c.bf16 %v976_v3, %v972_v2  ;;  %v996_v18 = vpack.c.bf16 %v968_v60, %v964_v58 }
 0x334   :  { %1134 = vmatpush.bf16.msra.mxu1 %v998_v25 }
 0x335   :  { %v927_v17 = vpop.f32.mrf.mxu2 }
 0x336   :  { %v956_v15 = vpop.f32.mrf.mxu3  ;;  %v928_v8 = vadd.f32 %v927_v17, %v2091_v36 }
 0x337   :  { %1106 = vmatpush.bf16.msra.mxu0 %v993_v1  ;;  %v957_v51 = vadd.f32 %v956_v15, %v2091_v36  ;;  %v2199_v15 = vpop.permute.xlu0 %1059 }
 0x338   :  { %1135 = vmatpush.bf16.msra.mxu1 %v994_v42  ;;  %v987_v54 = vmax.f32 %v928_v8, 0.0  ;;  %v2197_v42 = vpop.permute.xlu1 %1064 }
 0x339   :  { %v988_v44 = vmax.f32 %v957_v51, 0.0 }
 0x33a   :  { %1552 = vmatmul.msk.bf16.vlgmr.msra.gmra.mxu0 %vm324_vm2, %v1588_v63 }
 0x33b   :  { %1556 = vmatmul.msk.bf16.vlgmr.msra.gmra.mxu1 %vm324_vm2, %v1588_v63 }
 0x33d   :  { %v929_v6 = vpop.f32.mrf.mxu2 }
 0x33e   :  { %v930_v35 = vadd.f32 %v929_v6, %v2089_v0  ;;  %v958_v47 = vpop.f32.mrf.mxu3 }
 0x33f   :  { %v959_v20 = vadd.f32 %v958_v47, %v2089_v0  ;;  %v2209_v47 = vpop.permute.xlu0 %1054 }
 0x340   :  { %v991_v7 = vmax.f32 %v930_v35, 0.0  ;;  %v2207_v35 = vpop.permute.xlu1 %1039 }
 0x341   :  { %v992_v36 = vmax.f32 %v959_v20, 0.0 }
 0x342   :  { %v1007_v24 = vpack.c.bf16 %v991_v7, %v987_v54 }
 0x343   :  { %v1008_v0 = vpack.c.bf16 %v992_v36, %v988_v44 }
 0x344   :  { %1161 = vmatpush.bf16.msra.mxu2 %v1007_v24 }
 0x345   :  { %1190 = vmatpush.bf16.msra.mxu3 %v1008_v0  ;;  %v2222_v0 = vpop.permute.xlu2 %1044 }
 0x347   :  { %v2232_v45 = vpop.permute.xlu0 %1029 }
 0x348   :  { %1162 = vmatpush.bf16.msra.mxu2 %v1003_v4  ;;  %v2228_v16 = vpop.permute.xlu1 %1034 }
 0x349   :  { %1191 = vmatpush.bf16.msra.mxu3 %v1004_v12 }
 0x34a   :  { %1553 = vmatmul.msk.bf16.gmra.mxu0 %vm324_vm2, %v1589_v40 }
 0x34b   :  { %1557 = vmatmul.msk.bf16.gmra.mxu1 %vm324_vm2, %v1589_v40 }
 0x34c   :  { %1163 = vmatpush.bf16.msra.mxu2 %v999_v59 }
 0x34d   :  { %1192 = vmatpush.bf16.msra.mxu3 %v1000_v14 }
 0x350   :  { %1164 = vmatpush.bf16.msra.mxu2 %v995_v38 }
 0x351   :  { %1193 = vmatpush.bf16.msra.mxu3 %v996_v18 }
 0x353   :  { %1560 = vmatmul.msk.bf16.vlgmr.msra.gmra.mxu2 %vm324_vm2, %v1588_v63 }
 0x354   :  { %1564 = vmatmul.msk.bf16.vlgmr.msra.gmra.mxu3 %vm324_vm2, %v1588_v63 }
 0x35a   :  { %1554 = vmatmul.msk.bf16.gmra.mxu0 %vm324_vm2, %v1590_v22 }
 0x35b   :  { %1558 = vmatmul.msk.bf16.gmra.mxu1 %vm324_vm2, %v1590_v22 }
 0x363   :  { %1561 = vmatmul.msk.bf16.gmra.mxu2 %vm324_vm2, %v1589_v40 }
 0x364   :  { %1565 = vmatmul.msk.bf16.gmra.mxu3 %vm324_vm2, %v1589_v40 }
 0x36a   :  { %1555 = vmatmul.msk.bf16.gmra.mxu0 %vm324_vm2, %v1591_v57 }
 0x36b   :  { %1559 = vmatmul.msk.bf16.gmra.mxu1 %vm324_vm2, %v1591_v57 }
 0x373   :  { %1562 = vmatmul.msk.bf16.gmra.mxu2 %vm324_vm2, %v1590_v22 }
 0x374   :  { %1566 = vmatmul.msk.bf16.gmra.mxu3 %vm324_vm2, %v1590_v22 }
 0x383   :  { %1563 = vmatmul.msk.bf16.gmra.mxu2 %vm324_vm2, %v1591_v57 }
 0x384   :  { %1567 = vmatmul.msk.bf16.gmra.mxu3 %vm324_vm2, %v1591_v57 }
 0x3b7   :  { %v2185_v13 = vpop.f32.mrf.mxu0 }
 0x3b8   :  { %v2187_v27 = vpop.f32.mrf.mxu1  ;;  %v1109_v22 = vadd.f32 %v2185_v13, %v2232_v45  ;;  %v1263_v13 = vld [vmem:[%s2278_s4] sm:$0x1]  ;;  %s1624_s4 = smov [#allocation3]  }
 0x3b9   :  { %s1349_s21 = sshll.u32 %s1624_s4, 4  ;;  %s1350_s21 = int_to_ptr.vmem [resolvable:$true] %s1349_s21 }
 0x3bf   :  { %v1110_v11 = vpop.f32.mrf.mxu0 }
 0x3c0   :  { %v1139_v61 = vpop.f32.mrf.mxu1  ;;  %v1111_v59 = vadd.f32 %v1110_v11, %v2228_v16 }
 0x3c1   :  { %v1140_v58 = vadd.f32 %v1139_v61, %v2228_v16 }
 0x3c7   :  { %v1113_v26 = vpop.f32.mrf.mxu0 }
 0x3c8   :  { %v1142_v31 = vpop.f32.mrf.mxu1  ;;  %v1114_v3 = vadd.f32 %v1113_v26, %v2207_v35  ;;  %v1138_v26 = vadd.f32 %v2187_v27, %v2232_v45 }
 0x3c9   :  { %v1143_v19 = vadd.f32 %v1142_v31, %v2207_v35 }
 0x3ca   :  { %v1223_v57 = vmax.f32 %v1114_v3, 0.0  ;;  %v1216_v61 = vmax.f32 %v1138_v26, 0.0 }
 0x3cb   :  { %v1224_v31 = vmax.f32 %v1143_v19, 0.0 }
 0x3cf   :  { %v1115_v10 = vpop.f32.mrf.mxu0 }
 0x3d0   :  { %v1144_v37 = vpop.f32.mrf.mxu1  ;;  %v1116_v5 = vadd.f32 %v1115_v10, %v2222_v0  ;;  %v1219_v10 = vmax.f32 %v1111_v59, 0.0 }
 0x3d1   :  { %v1145_v4 = vadd.f32 %v1144_v37, %v2222_v0  ;;  %v1220_v37 = vmax.f32 %v1140_v58, 0.0 }
 0x3d2   :  { %v1227_v60 = vmax.f32 %v1116_v5, 0.0 }
 0x3d3   :  { %v1228_v38 = vmax.f32 %v1145_v4, 0.0 }
 0x3d4   :  { %v1251_v11 = vpack.c.bf16 %v1227_v60, %v1223_v57 }
 0x3d6   :  { %v2189_v9 = vpop.f32.mrf.mxu2 }
 0x3d7   :  { %v2191_v28 = vpop.f32.mrf.mxu3  ;;  %v1118_v43 = vpop.f32.mrf.mxu0 }
 0x3d8   :  { %v1147_v25 = vpop.f32.mrf.mxu1  ;;  %v1119_v24 = vadd.f32 %v1118_v43, %v2205_v52  ;;  %v1252_v43 = vpack.c.bf16 %v1228_v38, %v1224_v31 }
 0x3d9   :  { %v1148_v53 = vadd.f32 %v1147_v25, %v2205_v52  ;;  %v1215_v25 = vmax.f32 %v1109_v22, 0.0 }
 0x3da   :  { %v1231_v12 = vmax.f32 %v1119_v24, 0.0 }
 0x3db   :  { %v1232_v2 = vmax.f32 %v1148_v53, 0.0 }
 0x3de   :  { %v2193_v34 = vpop.f32.mrf.mxu2 }
 0x3df   :  { %v2195_v62 = vpop.f32.mrf.mxu3  ;;  %v1120_v1 = vpop.f32.mrf.mxu0 }
 0x3e0   :  { %v1149_v17 = vpop.f32.mrf.mxu1  ;;  %v1121_v21 = vadd.f32 %v1120_v1, %v2209_v47 }
 0x3e1   :  { %v1150_v55 = vadd.f32 %v1149_v17, %v2209_v47 }
 0x3e2   :  { %v1235_v48 = vmax.f32 %v1121_v21, 0.0 }
 0x3e3   :  { %v1236_v40 = vmax.f32 %v1150_v55, 0.0 }
 0x3e4   :  { %v1255_v14 = vpack.c.bf16 %v1235_v48, %v1231_v12 }
 0x3e5   :  { %v1256_v18 = vpack.c.bf16 %v1236_v40, %v1232_v2 }
 0x3e6   :  { %v2201_v63 = vpop.f32.mrf.mxu2 }
 0x3e7   :  { %v2203_v8 = vpop.f32.mrf.mxu3  ;;  %v1123_v51 = vpop.f32.mrf.mxu0 }
 0x3e8   :  { %v1152_v6 = vpop.f32.mrf.mxu1  ;;  %v1124_v33 = vadd.f32 %v1123_v51, %v2199_v15  ;;  %v1247_v51 = vpack.c.bf16 %v1219_v10, %v1215_v25 }
 0x3e9   :  { %v1153_v50 = vadd.f32 %v1152_v6, %v2199_v15  ;;  %v1248_v6 = vpack.c.bf16 %v1220_v37, %v1216_v61 }
 0x3ea   :  { %v1239_v29 = vmax.f32 %v1124_v33, 0.0 }
 0x3eb   :  { %v1240_v23 = vmax.f32 %v1153_v50, 0.0 }
 0x3ee   :  { %v2212_v20 = vpop.f32.mrf.mxu2 }
 0x3ef   :  { %v2215_v54 = vpop.f32.mrf.mxu3  ;;  %v1125_v7 = vpop.f32.mrf.mxu0 }
 0x3f0   :  { %v1126_v44 = vadd.f32 %v1125_v7, %v2197_v42  ;;  %v1154_v36 = vpop.f32.mrf.mxu1  ;;  %v1203_v4 = vadd.f32 %v2215_v54, %v2222_v0  ;;  %v1198_v54 = vadd.f32 %v2195_v62, %v2228_v16 }
 0x3f1   :  { %v1155_v56 = vadd.f32 %v1154_v36, %v2197_v42 }
 0x3f2   :  { %v1243_v32 = vmax.f32 %v1126_v44, 0.0 }
 0x3f3   :  { %v1244_v49 = vmax.f32 %v1155_v56, 0.0 }
 0x3f4   :  { %v1259_v39 = vpack.c.bf16 %v1243_v32, %v1239_v29 }
 0x3f5   :  { %v1260_v30 = vpack.c.bf16 %v1244_v49, %v1240_v23 }
 0x3f6   :  { %v1176_v41 = vpop.f32.mrf.mxu2  ;;  %1278 = vmatpush.bf16.msrb.mxu0 %v1259_v39 }
 0x3f7   :  { %v1205_v46 = vpop.f32.mrf.mxu3  ;;  %1291 = vmatpush.bf16.msrb.mxu1 %v1260_v30  ;;  %v1177_v29 = vadd.f32 %v1176_v41, %v2205_v52 }
 0x3f8   :  { %v1206_v23 = vadd.f32 %v1205_v46, %v2205_v52  ;;  %v1201_v52 = vadd.f32 %v2203_v8, %v2207_v35  ;;  %v1196_v8 = vadd.f32 %v2191_v28, %v2232_v45 }
 0x3f9   :  { %v1233_v30 = vmax.f32 %v1177_v29, 0.0 }
 0x3fa   :  { %1279 = vmatpush.bf16.msrb.mxu0 %v1255_v14  ;;  %v1234_v3 = vmax.f32 %v1206_v23, 0.0  ;;  %v1218_v58 = vmax.f32 %v1196_v8, 0.0 }
 0x3fb   :  { %1292 = vmatpush.bf16.msrb.mxu1 %v1256_v18  ;;  %v1268_v18 = vpop.permute.xlu2 %1267 }
 0x3fc   :  { %v1270_v22 = vperm.slane %v1268_v18, 0 }
 0x3fe   :  { %v1178_v1 = vpop.f32.mrf.mxu2  ;;  %1280 = vmatpush.bf16.msrb.mxu0 %v1251_v11  ;;  %v1339_v11 = vlaneseq }
 0x3ff   :  { %v1207_v17 = vpop.f32.mrf.mxu3  ;;  %1293 = vmatpush.bf16.msrb.mxu1 %v1252_v43  ;;  %v1179_v44 = vadd.f32 %v1178_v1, %v2209_v47 }
 0x400   :  { %v1208_v56 = vadd.f32 %v1207_v17, %v2209_v47  ;;  %vm1341_vm5 = vcmp.lt.s32.totalorder %v1339_v11, 512 }
 0x401   :  { %v1237_v48 = vmax.f32 %v1179_v44, 0.0 }
 0x402   :  { %1281 = vmatpush.bf16.msrb.mxu0 %v1247_v51  ;;  %v1238_v40 = vmax.f32 %v1208_v56, 0.0 }
 0x403   :  { %1294 = vmatpush.bf16.msrb.mxu1 %v1248_v6  ;;  %v1257_v41 = vpack.c.bf16 %v1237_v48, %v1233_v30 }
 0x404   :  { %v1258_v19 = vpack.c.bf16 %v1238_v40, %v1234_v3 }
 0x405   :  { %1568 = vmatmul.msk.bf16.vlgmr.msrb.gmra.mxu0 %vm324_vm2, %v1263_v13 }
 0x406   :  { %v1181_v27 = vpop.f32.mrf.mxu2  ;;  %1569 = vmatmul.msk.bf16.vlgmr.msrb.gmra.mxu1 %vm324_vm2, %v1263_v13 }
 0x407   :  { %v1210_v33 = vpop.f32.mrf.mxu3  ;;  %v1182_v50 = vadd.f32 %v1181_v27, %v2199_v15 }
 0x408   :  { %v1211_v7 = vadd.f32 %v1210_v33, %v2199_v15  ;;  %v1174_v15 = vadd.f32 %v2212_v20, %v2222_v0  ;;  %v1169_v20 = vadd.f32 %v2193_v34, %v2228_v16  ;;  %v1230_v0 = vmax.f32 %v1203_v4, 0.0 }
 0x409   :  { %v1241_v32 = vmax.f32 %v1182_v50, 0.0  ;;  %v1222_v34 = vmax.f32 %v1198_v54, 0.0 }
 0x40a   :  { %v1242_v49 = vmax.f32 %v1211_v7, 0.0  ;;  %v1229_v12 = vmax.f32 %v1174_v15, 0.0  ;;  %v1221_v46 = vmax.f32 %v1169_v20, 0.0 }
 0x40b   :  { %v1250_v16 = vpack.c.bf16 %v1222_v34, %v1218_v58 }
 0x40e   :  { %v1183_v21 = vpop.f32.mrf.mxu2 }
 0x40f   :  { %v1184_v36 = vadd.f32 %v1183_v21, %v2197_v42  ;;  %v1212_v55 = vpop.f32.mrf.mxu3 }
 0x410   :  { %v1213_v24 = vadd.f32 %v1212_v55, %v2197_v42  ;;  %v1172_v42 = vadd.f32 %v2201_v63, %v2207_v35  ;;  %v1167_v63 = vadd.f32 %v2189_v9, %v2232_v45  ;;  %v1226_v35 = vmax.f32 %v1201_v52, 0.0 }
 0x411   :  { %v1245_v53 = vmax.f32 %v1184_v36, 0.0 }
 0x412   :  { %v1246_v5 = vmax.f32 %v1213_v24, 0.0  ;;  %v1225_v2 = vmax.f32 %v1172_v42, 0.0  ;;  %v1254_v60 = vpack.c.bf16 %v1230_v0, %v1226_v35  ;;  %v1217_v14 = vmax.f32 %v1167_v63, 0.0 }
 0x413   :  { %v1261_v39 = vpack.c.bf16 %v1245_v53, %v1241_v32 }
 0x414   :  { %v1262_v47 = vpack.c.bf16 %v1246_v5, %v1242_v49  ;;  %v1253_v59 = vpack.c.bf16 %v1229_v12, %v1225_v2  ;;  %v1249_v62 = vpack.c.bf16 %v1221_v46, %v1217_v14 }
 0x415   :  { %1304 = vmatpush.bf16.msrb.mxu2 %v1261_v39 }
 0x416   :  { %1317 = vmatpush.bf16.msrb.mxu3 %v1262_v47 }
 0x419   :  { %1305 = vmatpush.bf16.msrb.mxu2 %v1257_v41 }
 0x41a   :  { %1318 = vmatpush.bf16.msrb.mxu3 %v1258_v19 }
 0x41d   :  { %1306 = vmatpush.bf16.msrb.mxu2 %v1253_v59 }
 0x41e   :  { %1319 = vmatpush.bf16.msrb.mxu3 %v1254_v60 }
 0x421   :  { %1307 = vmatpush.bf16.msrb.mxu2 %v1249_v62 }
 0x422   :  { %1320 = vmatpush.bf16.msrb.mxu3 %v1250_v16 }
 0x424   :  { %1570 = vmatmul.msk.bf16.vlgmr.msrb.gmra.mxu2 %vm324_vm2, %v1263_v13 }
 0x425   :  { %1571 = vmatmul.msk.bf16.vlgmr.msrb.gmra.mxu3 %vm324_vm2, %v1263_v13 }
 0x482   :  { %v1283_v9 = vpop.f32.mrf.mxu0 }
 0x483   :  { %v1296_v28 = vpop.f32.mrf.mxu1  ;;  %v1284_v1 = vadd.f32 %v1283_v9, %v1270_v22 }
 0x484   :  { %v1297_v57 = vadd.f32 %v1296_v28, %v1270_v22 }
 0x486   :  { %v1330_v37 = vrot.slane %v1297_v57, 7 }
 0x488   :  { %v1334_v17 = vsel %vm1333_vm3, %v1284_v1, %v1330_v37 }
 0x48a   :  { %v1285_v45 = vpop.f32.mrf.mxu0 }
 0x48b   :  { %v1298_v38 = vpop.f32.mrf.mxu1 }
 0x4a7   :  { %v1309_v26 = vpop.f32.mrf.mxu2 }
 0x4a8   :  { %v1310_v31 = vadd.f32 %v1309_v26, %v1270_v22  ;;  %v1322_v10 = vpop.f32.mrf.mxu3 }
 0x4a9   :  { %v1323_v43 = vadd.f32 %v1322_v10, %v1270_v22 }
 0x4aa   :  { %v1331_v25 = vrot.slane %v1310_v31, 6 }
 0x4ab   :  { %v1332_v61 = vrot.slane %v1323_v43, 5 }
 0x4ad   :  { %v1336_v51 = vsel %vm1335_vm4, %v1331_v25, %v1332_v61 }
 0x4ae   :  { %v1337_v6 = vsel %vm75_vm0, %v1334_v17, %v1336_v51 }
 0x4af   :  { %v1311_v13 = vpop.f32.mrf.mxu2  ;;  %1343 = vst.msk [vmem:[#allocation3] sm:$0xf] %vm1341_vm5, %v1337_v6 }
 0x4b0   :  { %v1324_v27 = vpop.f32.mrf.mxu3  ;;  %1354 = dma.vmem_to_hbm [thread:$0]  %s1350_s21, 64, %s1352_s3, [#allocation4]  }
 0x4b1   :  { %1621 = dma.done.wait [#allocation4], 64  }
 0x4b2   :  { %1622 = vsyncadd [#allocation4], 4294967232 }
 0x4b3   :  { %1359 = vsyncpa [#allocation4], 1 }

</bundles_post_ra>
